<compile_context>
chip_gen: v7x
topology: tpu7x:2x2x1
jax: 0.10.0
libtpu: 0.0.40
codegen_flags: <defaults>
</compile_context>

<pallas_src>
import jax
import jax.numpy as jnp
from jax.experimental import pallas as pl
from jax.experimental.pallas import tpu as pltpu


def dense_layer_kernel(x_ref, scale_ref, shift_ref, w_ref, out_ref, pad_ref):
    # x_ref:     (1, H, W, Cin)   raw NHWC input block (one image)
    # scale_ref: (1, Cin)         folded BN scale  (gamma / sqrt(var + eps))
    # shift_ref: (1, Cin)         folded BN shift  (beta - mean * scale)
    # w_ref:     (9, Cin, Cout)   conv weight, tap-major (k = dy*3 + dx)
    # out_ref:   (1, Cout, H*W)   lane-dense output (spatial axis on the lanes)
    # pad_ref:   (H+2, W+2, Cin)  VMEM scratch: zero-bordered activation
    _, H, W, Cin = x_ref.shape
    Cout = out_ref.shape[1]

    # Fused BatchNorm affine + ReLU on the un-duplicated activation.
    scale = scale_ref[...].reshape(1, 1, Cin)
    shift = shift_ref[...].reshape(1, 1, Cin)
    act = jnp.maximum(x_ref[0] * scale + shift, 0.0)

    # Zero-bordered activation in VMEM: the border stays exactly zero, so the
    # conv's SAME padding needs no mask stream.
    pad_ref[...] = jnp.zeros_like(pad_ref)
    pad_ref[1:H + 1, 1:W + 1, :] = act.astype(pad_ref.dtype)

    # 3x3 conv as 9 shifted (H*W, Cin) x (Cin, Cout) matmuls, f32 accumulate.
    acc = jnp.zeros((H * W, Cout), jnp.float32)
    for k in range(9):
        dy, dx = k // 3, k % 3
        tap = pad_ref[dy:dy + H, dx:dx + W, :].reshape(H * W, Cin)
        acc = acc + jnp.dot(tap, w_ref[k], preferred_element_type=jnp.float32)

    # Lane-dense store: (Cout, H*W) puts the long spatial axis on the 128 lanes.
    out_ref[0] = acc.T.astype(out_ref.dtype)


def dense_layer_forward(x_nchw, gamma, beta, running_mean, running_var, conv_w,
                        *, eps=1e-5, compute_dtype=None):
    """Fused eval-mode BN + ReLU + 3x3 SAME conv (no bias) + Dropout(identity).

    compute_dtype: dtype of the streamed activation / conv weight (e.g.
    jnp.bfloat16 to halve HBM traffic on this bandwidth-bound layer).  Defaults
    to the input dtype so numerics match the float32 PyTorch module exactly.
    """
    N, Cin, H, W = x_nchw.shape
    Cout = conv_w.shape[0]
    if compute_dtype is None:
        compute_dtype = x_nchw.dtype

    # Fold eval-mode BatchNorm into a per-channel affine (kept in f32).
    scale = (gamma / jnp.sqrt(running_var + eps)).astype(jnp.float32)
    shift = (beta - running_mean * scale).astype(jnp.float32)
    scale2d = scale.reshape(1, Cin)
    shift2d = shift.reshape(1, Cin)

    # NCHW -> NHWC (channels on the lane dim); single un-duplicated stream.
    x_nhwc = jnp.transpose(x_nchw, (0, 2, 3, 1)).astype(compute_dtype)

    # Conv weight (Cout, Cin, 3, 3) -> (9, Cin, Cout), tap-major k = dy*3 + dx.
    w9 = jnp.transpose(conv_w, (2, 3, 1, 0)).reshape(9, Cin, Cout)
    w9 = w9.astype(compute_dtype)

    out = pl.pallas_call(
        dense_layer_kernel,
        out_shape=jax.ShapeDtypeStruct((N, Cout, H * W), x_nchw.dtype),
        grid_spec=pltpu.PrefetchScalarGridSpec(
            num_scalar_prefetch=0,
            grid=(N,),
            in_specs=[
                pl.BlockSpec((1, H, W, Cin), lambda n: (n, 0, 0, 0)),
                pl.BlockSpec((1, Cin), lambda n: (0, 0)),
                pl.BlockSpec((1, Cin), lambda n: (0, 0)),
                pl.BlockSpec((9, Cin, Cout), lambda n: (0, 0, 0)),
            ],
            out_specs=pl.BlockSpec((1, Cout, H * W), lambda n: (n, 0, 0)),
            scratch_shapes=[pltpu.VMEM((H + 2, W + 2, Cin), compute_dtype)],
        ),
        compiler_params=pltpu.CompilerParams(
            dimension_semantics=("parallel",)),
    )(x_nhwc, scale2d, shift2d, w9)

    # (N, Cout, H*W) -> (N, Cout, H, W): pure reshape, no transpose needed.
    return out.reshape(N, Cout, H, W)


def reference_forward(x, gamma, beta, mean, var, w, eps=1e-5):
    # plain-JAX reference (eval-mode BN + ReLU + 3x3 SAME conv, no bias)
    xn = (x - mean[None, :, None, None]) / jnp.sqrt(var[None, :, None, None] + eps)
    a = jnp.maximum(xn * gamma[None, :, None, None] + beta[None, :, None, None], 0.0)
    return jax.lax.conv_general_dilated(
        a, w, window_strides=(1, 1), padding="SAME",
        dimension_numbers=("NCHW", "OIHW", "NCHW"))


if __name__ == "__main__":
    key = jax.random.PRNGKey(0)
    k1, k2, k3, k4, k5, k6 = jax.random.split(key, 6)

    N, Cin, H, W, Cout = 2, 4, 16, 16, 8
    x = jax.random.normal(k1, (N, Cin, H, W), jnp.float32)

    # deterministic synthetic parameters (BatchNorm2d(4) + Conv2d(4, 8, 3))
    gamma = jax.random.uniform(k2, (Cin,), jnp.float32, 0.5, 1.5)
    beta = 0.1 * jax.random.normal(k3, (Cin,), jnp.float32)
    running_mean = 0.1 * jax.random.normal(k4, (Cin,), jnp.float32)
    running_var = jax.random.uniform(k5, (Cin,), jnp.float32, 0.5, 1.5)
    conv_w = 0.1 * jax.random.normal(k6, (Cout, Cin, 3, 3), jnp.float32)

    out = dense_layer_forward(x, gamma, beta, running_mean, running_var, conv_w)
    out = jax.block_until_ready(out)

    ref = reference_forward(x, gamma, beta, running_mean, running_var, conv_w)
    assert out.shape == (N, Cout, H, W), out.shape
    assert jnp.allclose(out, ref, atol=1e-4, rtol=1e-4), "mismatch vs reference"

    print("KERNEL_OK")
</pallas_src>

<mosaic_0001>
module attributes {stable_mosaic.version = 11 : i64} {
  func.func @dense_layer_kernel(%arg0: i32, %arg1: memref<1x16x16x4xf32, #tpu.memory_space<vmem>>, %arg2: memref<1x4xf32, #tpu.memory_space<vmem>>, %arg3: memref<1x4xf32, #tpu.memory_space<vmem>>, %arg4: memref<9x4x8xf32, #tpu.memory_space<vmem>>, %arg5: memref<1x8x256xf32, #tpu.memory_space<vmem>>, %arg6: memref<18x18x4xf32, #tpu.memory_space<vmem>>) attributes {dimension_semantics = [#tpu.dimension_semantics<parallel>], iteration_bounds = array<i64: 2>, scalar_prefetch = 0 : i64, scratch_operands = 1 : i64, tpu.core_type = #tpu.core_type<tc>, window_params = [{transform_indices = @transform_0, window_bounds = array<i64: 1, 16, 16, 4>}, {pipeline_mode = #tpu.pipeline_mode<synchronous>, transform_indices = @transform_1, window_bounds = array<i64: 1, 4>}, {pipeline_mode = #tpu.pipeline_mode<synchronous>, transform_indices = @transform_2, window_bounds = array<i64: 1, 4>}, {pipeline_mode = #tpu.pipeline_mode<synchronous>, transform_indices = @transform_3, window_bounds = array<i64: 9, 4, 8>}, {transform_indices = @transform_4, window_bounds = array<i64: 1, 8, 256>}]} {
    %c0 = arith.constant 0 : index
    %c0_0 = arith.constant 0 : index
    %0 = vector.load %arg2[%c0, %c0_0] : memref<1x4xf32, #tpu.memory_space<vmem>>, vector<1x4xf32>
    %1 = vector.shape_cast %0 : vector<1x4xf32> to vector<1x1x4xf32>
    %c0_1 = arith.constant 0 : index
    %c0_2 = arith.constant 0 : index
    %2 = vector.load %arg3[%c0_1, %c0_2] : memref<1x4xf32, #tpu.memory_space<vmem>>, vector<1x4xf32>
    %3 = vector.shape_cast %2 : vector<1x4xf32> to vector<1x1x4xf32>
    %c0_3 = arith.constant 0 : index
    %c0_4 = arith.constant 0 : index
    %c0_5 = arith.constant 0 : index
    %c0_6 = arith.constant 0 : index
    %4 = vector.load %arg1[%c0_3, %c0_4, %c0_5, %c0_6] : memref<1x16x16x4xf32, #tpu.memory_space<vmem>>, vector<1x16x16x4xf32>
    %5 = vector.shape_cast %4 : vector<1x16x16x4xf32> to vector<16x16x4xf32>
    %6 = vector.broadcast %1 : vector<1x1x4xf32> to vector<16x16x4xf32>
    %7 = arith.mulf %5, %6 : vector<16x16x4xf32>
    %8 = vector.broadcast %3 : vector<1x1x4xf32> to vector<16x16x4xf32>
    %9 = arith.addf %7, %8 : vector<16x16x4xf32>
    %cst = arith.constant 0.000000e+00 : f32
    %10 = vector.broadcast %cst : f32 to vector<16x16x4xf32>
    %11 = arith.maximumf %9, %10 : vector<16x16x4xf32>
    %cst_7 = arith.constant 0.000000e+00 : f32
    %12 = vector.broadcast %cst_7 : f32 to vector<18x18x4xf32>
    %c0_8 = arith.constant 0 : index
    %c0_9 = arith.constant 0 : index
    %c0_10 = arith.constant 0 : index
    %13 = vector.load %arg6[%c0_8, %c0_9, %c0_10] : memref<18x18x4xf32, #tpu.memory_space<vmem>>, vector<18x18x4xf32>
    tpu.vector_store %arg6[%c0_8, %c0_9, %c0_10], %12 {strides = array<i32>} : memref<18x18x4xf32, #tpu.memory_space<vmem>>, vector<18x18x4xf32>,
    %c1 = arith.constant 1 : index
    %c1_11 = arith.constant 1 : index
    %c0_12 = arith.constant 0 : index
    %14 = vector.load %arg6[%c1, %c1_11, %c0_12] : memref<18x18x4xf32, #tpu.memory_space<vmem>>, vector<16x16x4xf32>
    tpu.vector_store %arg6[%c1, %c1_11, %c0_12], %11 {strides = array<i32>} : memref<18x18x4xf32, #tpu.memory_space<vmem>>, vector<16x16x4xf32>,
    %cst_13 = arith.constant 0.000000e+00 : f32
    %15 = vector.broadcast %cst_13 : f32 to vector<256x8xf32>
    %c0_14 = arith.constant 0 : index
    %c0_15 = arith.constant 0 : index
    %c0_16 = arith.constant 0 : index
    %16 = vector.load %arg6[%c0_14, %c0_15, %c0_16] : memref<18x18x4xf32, #tpu.memory_space<vmem>>, vector<16x16x4xf32>
    %17 = vector.shape_cast %16 : vector<16x16x4xf32> to vector<256x4xf32>
    %c0_17 = arith.constant 0 : index
    %c0_18 = arith.constant 0 : index
    %c0_19 = arith.constant 0 : index
    %18 = vector.load %arg4[%c0_17, %c0_18, %c0_19] : memref<9x4x8xf32, #tpu.memory_space<vmem>>, vector<1x4x8xf32>
    %19 = vector.shape_cast %18 : vector<1x4x8xf32> to vector<4x8xf32>
    %cst_20 = arith.constant dense<0.000000e+00> : vector<256x8xf32>
    %20 = tpu.matmul %17, %19, %cst_20 {dimension_numbers = #tpu.dot_dimension_numbers<[1], [0], [0], [1], [0, 0, 1, 1], [], []>} : vector<256x4xf32>, vector<4x8xf32>, vector<256x8xf32> -> vector<256x8xf32>
    %21 = arith.addf %15, %20 : vector<256x8xf32>
    %c0_21 = arith.constant 0 : index
    %c1_22 = arith.constant 1 : index
    %c0_23 = arith.constant 0 : index
    %22 = vector.load %arg6[%c0_21, %c1_22, %c0_23] : memref<18x18x4xf32, #tpu.memory_space<vmem>>, vector<16x16x4xf32>
    %23 = vector.shape_cast %22 : vector<16x16x4xf32> to vector<256x4xf32>
    %c1_24 = arith.constant 1 : index
    %c0_25 = arith.constant 0 : index
    %c0_26 = arith.constant 0 : index
    %24 = vector.load %arg4[%c1_24, %c0_25, %c0_26] : memref<9x4x8xf32, #tpu.memory_space<vmem>>, vector<1x4x8xf32>
    %25 = vector.shape_cast %24 : vector<1x4x8xf32> to vector<4x8xf32>
    %cst_27 = arith.constant dense<0.000000e+00> : vector<256x8xf32>
    %26 = tpu.matmul %23, %25, %cst_27 {dimension_numbers = #tpu.dot_dimension_numbers<[1], [0], [0], [1], [0, 0, 1, 1], [], []>} : vector<256x4xf32>, vector<4x8xf32>, vector<256x8xf32> -> vector<256x8xf32>
    %27 = arith.addf %21, %26 : vector<256x8xf32>
    %c0_28 = arith.constant 0 : index
    %c2 = arith.constant 2 : index
    %c0_29 = arith.constant 0 : index
    %28 = vector.load %arg6[%c0_28, %c2, %c0_29] : memref<18x18x4xf32, #tpu.memory_space<vmem>>, vector<16x16x4xf32>
    %29 = vector.shape_cast %28 : vector<16x16x4xf32> to vector<256x4xf32>
    %c2_30 = arith.constant 2 : index
    %c0_31 = arith.constant 0 : index
    %c0_32 = arith.constant 0 : index
    %30 = vector.load %arg4[%c2_30, %c0_31, %c0_32] : memref<9x4x8xf32, #tpu.memory_space<vmem>>, vector<1x4x8xf32>
    %31 = vector.shape_cast %30 : vector<1x4x8xf32> to vector<4x8xf32>
    %cst_33 = arith.constant dense<0.000000e+00> : vector<256x8xf32>
    %32 = tpu.matmul %29, %31, %cst_33 {dimension_numbers = #tpu.dot_dimension_numbers<[1], [0], [0], [1], [0, 0, 1, 1], [], []>} : vector<256x4xf32>, vector<4x8xf32>, vector<256x8xf32> -> vector<256x8xf32>
    %33 = arith.addf %27, %32 : vector<256x8xf32>
    %c1_34 = arith.constant 1 : index
    %c0_35 = arith.constant 0 : index
    %c0_36 = arith.constant 0 : index
    %34 = vector.load %arg6[%c1_34, %c0_35, %c0_36] : memref<18x18x4xf32, #tpu.memory_space<vmem>>, vector<16x16x4xf32>
    %35 = vector.shape_cast %34 : vector<16x16x4xf32> to vector<256x4xf32>
    %c3 = arith.constant 3 : index
    %c0_37 = arith.constant 0 : index
    %c0_38 = arith.constant 0 : index
    %36 = vector.load %arg4[%c3, %c0_37, %c0_38] : memref<9x4x8xf32, #tpu.memory_space<vmem>>, vector<1x4x8xf32>
    %37 = vector.shape_cast %36 : vector<1x4x8xf32> to vector<4x8xf32>
    %cst_39 = arith.constant dense<0.000000e+00> : vector<256x8xf32>
    %38 = tpu.matmul %35, %37, %cst_39 {dimension_numbers = #tpu.dot_dimension_numbers<[1], [0], [0], [1], [0, 0, 1, 1], [], []>} : vector<256x4xf32>, vector<4x8xf32>, vector<256x8xf32> -> vector<256x8xf32>
    %39 = arith.addf %33, %38 : vector<256x8xf32>
    %c1_40 = arith.constant 1 : index
    %c1_41 = arith.constant 1 : index
    %c0_42 = arith.constant 0 : index
    %40 = vector.load %arg6[%c1_40, %c1_41, %c0_42] : memref<18x18x4xf32, #tpu.memory_space<vmem>>, vector<16x16x4xf32>
    %41 = vector.shape_cast %40 : vector<16x16x4xf32> to vector<256x4xf32>
    %c4 = arith.constant 4 : index
    %c0_43 = arith.constant 0 : index
    %c0_44 = arith.constant 0 : index
    %42 = vector.load %arg4[%c4, %c0_43, %c0_44] : memref<9x4x8xf32, #tpu.memory_space<vmem>>, vector<1x4x8xf32>
    %43 = vector.shape_cast %42 : vector<1x4x8xf32> to vector<4x8xf32>
    %cst_45 = arith.constant dense<0.000000e+00> : vector<256x8xf32>
    %44 = tpu.matmul %41, %43, %cst_45 {dimension_numbers = #tpu.dot_dimension_numbers<[1], [0], [0], [1], [0, 0, 1, 1], [], []>} : vector<256x4xf32>, vector<4x8xf32>, vector<256x8xf32> -> vector<256x8xf32>
    %45 = arith.addf %39, %44 : vector<256x8xf32>
    %c1_46 = arith.constant 1 : index
    %c2_47 = arith.constant 2 : index
    %c0_48 = arith.constant 0 : index
    %46 = vector.load %arg6[%c1_46, %c2_47, %c0_48] : memref<18x18x4xf32, #tpu.memory_space<vmem>>, vector<16x16x4xf32>
    %47 = vector.shape_cast %46 : vector<16x16x4xf32> to vector<256x4xf32>
    %c5 = arith.constant 5 : index
    %c0_49 = arith.constant 0 : index
    %c0_50 = arith.constant 0 : index
    %48 = vector.load %arg4[%c5, %c0_49, %c0_50] : memref<9x4x8xf32, #tpu.memory_space<vmem>>, vector<1x4x8xf32>
    %49 = vector.shape_cast %48 : vector<1x4x8xf32> to vector<4x8xf32>
    %cst_51 = arith.constant dense<0.000000e+00> : vector<256x8xf32>
    %50 = tpu.matmul %47, %49, %cst_51 {dimension_numbers = #tpu.dot_dimension_numbers<[1], [0], [0], [1], [0, 0, 1, 1], [], []>} : vector<256x4xf32>, vector<4x8xf32>, vector<256x8xf32> -> vector<256x8xf32>
    %51 = arith.addf %45, %50 : vector<256x8xf32>
    %c2_52 = arith.constant 2 : index
    %c0_53 = arith.constant 0 : index
    %c0_54 = arith.constant 0 : index
    %52 = vector.load %arg6[%c2_52, %c0_53, %c0_54] : memref<18x18x4xf32, #tpu.memory_space<vmem>>, vector<16x16x4xf32>
    %53 = vector.shape_cast %52 : vector<16x16x4xf32> to vector<256x4xf32>
    %c6 = arith.constant 6 : index
    %c0_55 = arith.constant 0 : index
    %c0_56 = arith.constant 0 : index
    %54 = vector.load %arg4[%c6, %c0_55, %c0_56] : memref<9x4x8xf32, #tpu.memory_space<vmem>>, vector<1x4x8xf32>
    %55 = vector.shape_cast %54 : vector<1x4x8xf32> to vector<4x8xf32>
    %cst_57 = arith.constant dense<0.000000e+00> : vector<256x8xf32>
    %56 = tpu.matmul %53, %55, %cst_57 {dimension_numbers = #tpu.dot_dimension_numbers<[1], [0], [0], [1], [0, 0, 1, 1], [], []>} : vector<256x4xf32>, vector<4x8xf32>, vector<256x8xf32> -> vector<256x8xf32>
    %57 = arith.addf %51, %56 : vector<256x8xf32>
    %c2_58 = arith.constant 2 : index
    %c1_59 = arith.constant 1 : index
    %c0_60 = arith.constant 0 : index
    %58 = vector.load %arg6[%c2_58, %c1_59, %c0_60] : memref<18x18x4xf32, #tpu.memory_space<vmem>>, vector<16x16x4xf32>
    %59 = vector.shape_cast %58 : vector<16x16x4xf32> to vector<256x4xf32>
    %c7 = arith.constant 7 : index
    %c0_61 = arith.constant 0 : index
    %c0_62 = arith.constant 0 : index
    %60 = vector.load %arg4[%c7, %c0_61, %c0_62] : memref<9x4x8xf32, #tpu.memory_space<vmem>>, vector<1x4x8xf32>
    %61 = vector.shape_cast %60 : vector<1x4x8xf32> to vector<4x8xf32>
    %cst_63 = arith.constant dense<0.000000e+00> : vector<256x8xf32>
    %62 = tpu.matmul %59, %61, %cst_63 {dimension_numbers = #tpu.dot_dimension_numbers<[1], [0], [0], [1], [0, 0, 1, 1], [], []>} : vector<256x4xf32>, vector<4x8xf32>, vector<256x8xf32> -> vector<256x8xf32>
    %63 = arith.addf %57, %62 : vector<256x8xf32>
    %c2_64 = arith.constant 2 : index
    %c2_65 = arith.constant 2 : index
    %c0_66 = arith.constant 0 : index
    %64 = vector.load %arg6[%c2_64, %c2_65, %c0_66] : memref<18x18x4xf32, #tpu.memory_space<vmem>>, vector<16x16x4xf32>
    %65 = vector.shape_cast %64 : vector<16x16x4xf32> to vector<256x4xf32>
    %c8 = arith.constant 8 : index
    %c0_67 = arith.constant 0 : index
    %c0_68 = arith.constant 0 : index
    %66 = vector.load %arg4[%c8, %c0_67, %c0_68] : memref<9x4x8xf32, #tpu.memory_space<vmem>>, vector<1x4x8xf32>
    %67 = vector.shape_cast %66 : vector<1x4x8xf32> to vector<4x8xf32>
    %cst_69 = arith.constant dense<0.000000e+00> : vector<256x8xf32>
    %68 = tpu.matmul %65, %67, %cst_69 {dimension_numbers = #tpu.dot_dimension_numbers<[1], [0], [0], [1], [0, 0, 1, 1], [], []>} : vector<256x4xf32>, vector<4x8xf32>, vector<256x8xf32> -> vector<256x8xf32>
    %69 = arith.addf %63, %68 : vector<256x8xf32>
    %70 = tpu.transpose %69, [1, 0] : vector<256x8xf32> -> vector<8x256xf32>
    %c0_70 = arith.constant 0 : index
    %c0_71 = arith.constant 0 : index
    %c0_72 = arith.constant 0 : index
    %71 = vector.load %arg5[%c0_70, %c0_71, %c0_72] : memref<1x8x256xf32, #tpu.memory_space<vmem>>, vector<1x8x256xf32>
    %72 = vector.shape_cast %71 : vector<1x8x256xf32> to vector<8x256xf32>
    %73 = vector.shape_cast %70 : vector<8x256xf32> to vector<1x8x256xf32>
    tpu.vector_store %arg5[%c0_70, %c0_71, %c0_72], %73 {strides = array<i32>} : memref<1x8x256xf32, #tpu.memory_space<vmem>>, vector<1x8x256xf32>,
    return
  }
  func.func @transform_0(%arg0: i32) -> (i32, i32, i32, i32) {
    %c0_i32 = arith.constant 0 : i32
    %c0_i32_0 = arith.constant 0 : i32
    %c0_i32_1 = arith.constant 0 : i32
    %c0_i32_2 = arith.constant 0 : i32
    return %arg0, %c0_i32, %c0_i32_0, %c0_i32_1 : i32, i32, i32, i32
  }
  func.func @transform_1(%arg0: i32) -> (i32, i32) {
    %c0_i32 = arith.constant 0 : i32
    %c0_i32_0 = arith.constant 0 : i32
    %c0_i32_1 = arith.constant 0 : i32
    return %c0_i32, %c0_i32_0 : i32, i32
  }
  func.func @transform_2(%arg0: i32) -> (i32, i32) {
    %c0_i32 = arith.constant 0 : i32
    %c0_i32_0 = arith.constant 0 : i32
    %c0_i32_1 = arith.constant 0 : i32
    return %c0_i32, %c0_i32_0 : i32, i32
  }
  func.func @transform_3(%arg0: i32) -> (i32, i32, i32) {
    %c0_i32 = arith.constant 0 : i32
    %c0_i32_0 = arith.constant 0 : i32
    %c0_i32_1 = arith.constant 0 : i32
    %c0_i32_2 = arith.constant 0 : i32
    return %c0_i32, %c0_i32_0, %c0_i32_1 : i32, i32, i32
  }
  func.func @transform_4(%arg0: i32) -> (i32, i32, i32) {
    %c0_i32 = arith.constant 0 : i32
    %c0_i32_0 = arith.constant 0 : i32
    %c0_i32_1 = arith.constant 0 : i32
    return %arg0, %c0_i32, %c0_i32_0 : i32, i32, i32
  }
}

</mosaic_0001>

<bundles_post_ra>
// kernel: tpu_custom_call.1
= control target key start
LH: loop header
LB: loop body
LE: loop exit
PB: predicated region body
PF: predicated region fallthrough
CT: control target
= control target key end

     0   :  { %9 = vsyncpa [#allocation4], 0  ;;  %s6589_s0 = inlined_call_operand.vmem [shape: f32[2,16,16,4], index: 0, kind: input, shape index: {}]   ;;  %s6590_s1 = inlined_call_operand.vmem [shape: f32[1,4], index: 1, kind: input, shape index: {}]   ;;  %s6591_s2 = inlined_call_operand.vmem [shape: f32[1,4], index: 2, kind: input, shape index: {}]   ;;  %s6592_s3 = inlined_call_operand.vmem [shape: f32[9,4,8], index: 3, kind: input, shape index: {}]   ;;  %s6593_s4 = inlined_call_operand.hbm [shape: f32[2,8,256], index: 4, kind: output, shape index: {}]  }
   0x1   :  { %11 = vsyncpa [#allocation4 + $0x1], 0  ;;  %s5471_s15 = smov 0   ;;  %s5473_s16 = smov 0  }
   0x2   :  { %s5475_s17 = smov 0   ;;  %s5477_s18 = smov 0  }
   0x3 LB: > { %s5492_s19 = sadd.s32 4294967295, %s5442_s18   ;;  %s4014_s20 = sadd.s32 4294967294, %s5442_s18   ;;  %s5442_s18 = sphi %s5477_s18, %s6703_s18   ;;  %s5438_s17 = sphi %s5475_s17, %s6702_s17   ;;  %s5434_s16 = sphi %s5473_s16, %s6701_s16   ;;  %s5430_s15 = sphi %s5471_s15, %s6700_s15  }
   0x4   : > { %s5496_s21 = sadd.s32 1, %s5442_s18   ;;  %s113_s22 = sadd.s32 1, %s5438_s17 }
   0x5   : > { %s110_s23 = ssub.s32 %s5442_s18, %s5496_s21  ;;  %p123_p0 = scmp.ne.s32.totalorder %s5438_s17, %s5434_s16 }
   0x6   : > { %p111_p1 = scmp.eq.s32.totalorder %s110_s23, 0  ;;  %p124_p2 = scmp.eq.s32.totalorder %s5492_s19, 1 }
   0x7   : > { %p129_p3 = scmp.ne.s32.totalorder %s5434_s16, %s5430_s15  ;;  %p130_p4 = scmp.eq.s32.totalorder %s4014_s20, 1 }
   0x8   : > { %s5507_s24 = scalar_select %p111_p1, %s5438_s17, %s113_s22  }
   0x9   : > { %p5509_p5 = por %p124_p2, %p123_p0  ;;  %p5513_p6 = por %p130_p4, %p129_p3 }
   0xa   : > { %p4017_p7 = scmp.ge.s32.totalorder %s5442_s18, 1  ;;  %p165_p8 = scmp.lt.s32.totalorder %s5442_s18, 3 }
   0xc   : > { %p166_p9 = pnand %p4017_p7, %p165_p8 }
   0xe   : > { %169 = sbr.rel (%p166_p9) target bundleno = 672 (0x2a0), region = 36 }
  0x15   : > { %v4023_v0 = vld [vmem:[%s6592_s3 + $0x4] sm:$0xf]  ;;  %vm590_vm0 = vcmask 1043456   ;;  %vm338_vm1 = vcmask 31744   ;;  %vm341_vm2 = vcmask 25600   ;;  %v5444_v1 = vmov 0.0  }
  0x16   : > { %4632 = vmatprep.subr.msk.mxu1 %vm590_vm0, %v4023_v0  ;;  %339 = vst.msk [vmem:[#allocation2] sm:$0xff] %vm338_vm1, %v5444_v1  ;;  %340 = vst.msk [vmem:[#allocation2 + $0x8] sm:$0xff] %vm338_vm1, %v5444_v1  ;;  %v5580_v2 = vld [vmem:[%s6592_s3 + $0x10] sm:$0xf]  ;;  %p191_p10 = scmp.lt.s32.totalorder %s5492_s19, 1  ;;  %s188_s11 = sand.u32 1, %s5434_s16  }
  0x17   : > { %343 = vst.msk [vmem:[#allocation2 + $0x18] sm:$0xff] %vm338_vm1, %v5444_v1  ;;  %344 = vst.msk [vmem:[#allocation2 + $0x20] sm:$0xff] %vm338_vm1, %v5444_v1  ;;  %4633 = vmatpush3.msk.msra.mxu1 %vm590_vm0, %v4023_v0  ;;  %4832 = vmatprep.subr.msk.mxu0 %vm590_vm0, %v5580_v2  ;;  %v459_v3 = vld [vmem:[%s6592_s3] sm:$0xf]  ;;  %v5592_v4 = vld [vmem:[%s6592_s3 + $0x14] sm:$0xf] }
  0x18   : > { %346 = vst.msk [vmem:[#allocation2 + $0x30] sm:$0xff] %vm338_vm1, %v5444_v1  ;;  %347 = vst.msk [vmem:[#allocation2 + $0x38] sm:$0xff] %vm338_vm1, %v5444_v1  ;;  %4833 = vmatpush3.msk.msra.mxu0 %vm590_vm0, %v5580_v2  ;;  %s192_s9 = scalar_select %p191_p10, %s5492_s19, 1  ;;  %4682 = vmatprep.subr.msk.mxu1 %vm590_vm0, %v459_v3  ;;  %v5603_v5 = vld [vmem:[%s6590_s1] ss:$0 sm:$0xff] }
  0x19   : > { %349 = vst.msk [vmem:[#allocation2 + $0x48] sm:$0xff] %vm338_vm1, %v5444_v1  ;;  %350 = vst.msk [vmem:[#allocation2 + $0x50] sm:$0xff] %vm338_vm1, %v5444_v1  ;;  %4882 = vmatprep.subr.msk.mxu0 %vm590_vm0, %v5592_v4  ;;  %v5613_v6 = vld [vmem:[%s6591_s2] ss:$0 sm:$0xff]  ;;  %v5621_v10 = vld [vmem:[%s6592_s3 + $0x8] sm:$0xf] }
  0x1a   : > { %352 = vst.msk [vmem:[#allocation2 + $0x60] sm:$0xff] %vm338_vm1, %v5444_v1  ;;  %353 = vst.msk [vmem:[#allocation2 + $0x68] sm:$0xff] %vm338_vm1, %v5444_v1  ;;  %s4333_s10 = sshll.u32 %s192_s9, 8  ;;  %s4018_s12 = sshll.u32 %s188_s11, 4 }
  0x1b   : > { %355 = vst.msk [vmem:[#allocation2 + $0x78] sm:$0xff] %vm338_vm1, %v5444_v1  ;;  %356 = vst.msk [vmem:[#allocation2 + $0x80] sm:$0xff] %vm338_vm1, %v5444_v1  ;;  %s5608_s20 = scalar_lea.vmem %s6589_s0, %s4333_s10  ;;  %s190_s13 = scalar_lea.vmem [#allocation3], %s4018_s12 }
  0x1c   : > { %358 = vst.msk [vmem:[#allocation2 + $0x90] sm:$0xff] %vm338_vm1, %v5444_v1  ;;  %359 = vst.msk [vmem:[#allocation2 + $0x98] sm:$0xff] %vm338_vm1, %v5444_v1  ;;  %v198_v7 = vld [vmem:[%s5608_s20] sm:$0xff]  ;;  %v199_v8 = vld [vmem:[%s5608_s20 + $0x8] sm:$0xff]  ;;  %s3955_s14 = sshll.u32 %s190_s13, 4  ;;  %s3941_s28 = scalar_lea.sflag [#allocation4], %s188_s11  ;;  %s6544_s14 = int_to_ptr.vmem [resolvable:$true] %s3955_s14 }
  0x1d   : > { %361 = vst.msk [vmem:[#allocation2 + $0xa8] sm:$0xff] %vm338_vm1, %v5444_v1  ;;  %362 = vst.msk [vmem:[#allocation2 + $0xb0] sm:$0xff] %vm338_vm1, %v5444_v1  ;;  %v200_v9 = vld [vmem:[%s5608_s20 + $0x10] sm:$0xff]  ;;  %v460_v11 = vld [vmem:[#allocation2 + $0x1] sm:$0xff]  ;;  %v236_v13 = vmul.f32 %v5603_v5, %v198_v7  ;;  %v237_v14 = vmul.f32 %v5603_v5, %v199_v8  ;;  %s5380_s29 = scalar_lea.vmem %s6544_s14, 256  ;;  %s5445_s30 = smov [#allocation3]  }
  0x1e   : > { %364 = vst.msk [vmem:[#allocation2 + $0xc0] sm:$0xff] %vm338_vm1, %v5444_v1  ;;  %365 = vst.msk [vmem:[#allocation2 + $0xc8] sm:$0xff] %vm338_vm1, %v5444_v1  ;;  %v238_v15 = vmul.f32 %v5603_v5, %v200_v9  ;;  %v201_v16 = vld [vmem:[%s5608_s20 + $0x18] sm:$0xff]  ;;  %4634 = vmatprep.mubr.msk.f32.mxu1 %vm338_vm1, %v460_v11  ;;  %v202_v18 = vld [vmem:[%s5608_s20 + $0x20] sm:$0xff]  ;;  %p5381_p11 = scmp.ne.s32.totalorder %s6544_s14, %s5380_s29 }
  0x1f   : > { %367 = vst.msk [vmem:[#allocation2 + $0xd8] sm:$0xff] %vm338_vm1, %v5444_v1  ;;  %368 = vst.msk [vmem:[#allocation2 + $0xe0] sm:$0xff] %vm338_vm1, %v5444_v1  ;;  %v239_v17 = vmul.f32 %v5603_v5, %v201_v16  ;;  %v203_v19 = vld [vmem:[%s5608_s20 + $0x28] sm:$0xff]  ;;  %v204_v20 = vld [vmem:[%s5608_s20 + $0x30] sm:$0xff]  ;;  %v274_v21 = vadd.f32 %v5613_v6, %v236_v13  ;;  %v275_v22 = vadd.f32 %v5613_v6, %v237_v14 }
  0x20   : > { %370 = vst.msk [vmem:[#allocation2 + $0xf0] sm:$0xff] %vm338_vm1, %v5444_v1  ;;  %371 = vst.msk [vmem:[#allocation2 + $0xf8] sm:$0xff] %vm338_vm1, %v5444_v1  ;;  %v276_v23 = vadd.f32 %v5613_v6, %v238_v15  ;;  %v240_v24 = vmul.f32 %v5603_v5, %v202_v18  ;;  %v205_v25 = vld [vmem:[%s5608_s20 + $0x38] sm:$0xff]  ;;  %v241_v27 = vmul.f32 %v5603_v5, %v203_v19  ;;  %v206_v30 = vld [vmem:[%s5608_s20 + $0x40] sm:$0xff]  ;;  %p5382_p12 = pnand %p5381_p11, %p5509_p5 }
  0x21   : > { %373 = vst.msk [vmem:[#allocation2 + $0x108] sm:$0xff] %vm338_vm1, %v5444_v1  ;;  %374 = vst.msk [vmem:[#allocation2 + $0x110] sm:$0xff] %vm338_vm1, %v5444_v1  ;;  %v277_v26 = vadd.f32 %v5613_v6, %v239_v17  ;;  %v242_v28 = vmul.f32 %v5603_v5, %v204_v20  ;;  %v243_v29 = vmul.f32 %v5603_v5, %v205_v25  ;;  %v207_v31 = vld [vmem:[%s5608_s20 + $0x48] sm:$0xff]  ;;  %v208_v32 = vld [vmem:[%s5608_s20 + $0x50] sm:$0xff]  ;;  %v306_v33 = vmax.f32 %v274_v21, 0.0 }
  0x22   : > { %376 = vst.msk [vmem:[#allocation2 + $0x120] sm:$0xff] %vm338_vm1, %v5444_v1  ;;  %377 = vst.msk [vmem:[#allocation2 + $0x128] sm:$0xff] %vm338_vm1, %v5444_v1  ;;  %v307_v34 = vmax.f32 %v275_v22, 0.0  ;;  %v308_v35 = vmax.f32 %v276_v23, 0.0  ;;  %v278_v36 = vadd.f32 %v5613_v6, %v240_v24  ;;  %v209_v37 = vld [vmem:[%s5608_s20 + $0x58] sm:$0xff]  ;;  %v279_v39 = vadd.f32 %v5613_v6, %v241_v27  ;;  %v210_v42 = vld [vmem:[%s5608_s20 + $0x60] sm:$0xff]  ;;  %p5383_p13 = pneg %p5382_p12 }
  0x23   : > { %379 = vst.msk [vmem:[#allocation2 + $0x138] sm:$0xff] %vm338_vm1, %v5444_v1  ;;  %380 = vst.msk [vmem:[#allocation2 + $0x140] sm:$0xff] %vm338_vm1, %v5444_v1  ;;  %v309_v38 = vmax.f32 %v277_v26, 0.0  ;;  %v280_v40 = vadd.f32 %v5613_v6, %v242_v28  ;;  %v281_v41 = vadd.f32 %v5613_v6, %v243_v29  ;;  %v244_v44 = vmul.f32 %v5603_v5, %v206_v30  ;;  %v211_v47 = vld [vmem:[%s5608_s20 + $0x68] sm:$0xff]  ;;  %v212_v48 = vld [vmem:[%s5608_s20 + $0x70] sm:$0xff] }
  0x24   : > { %382 = vst.msk [vmem:[#allocation2 + $0x150] sm:$0xff] %vm338_vm1, %v5444_v1  ;;  %383 = vst.msk [vmem:[#allocation2 + $0x158] sm:$0xff] %vm338_vm1, %v5444_v1  ;;  %v310_v43 = vmax.f32 %v278_v36, 0.0  ;;  %v245_v45 = vmul.f32 %v5603_v5, %v207_v31  ;;  %v246_v46 = vmul.f32 %v5603_v5, %v208_v32  ;;  %v213_v49 = vld [vmem:[%s5608_s20 + $0x78] sm:$0xff]  ;;  %v311_v50 = vmax.f32 %v279_v39, 0.0  ;;  %v214_v62 = vld [vmem:[%s5608_s20 + $0x80] sm:$0xff] }
  0x25   : > { %385 = vst.msk [vmem:[#allocation2 + $0x168] sm:$0xff] %vm338_vm1, %v5444_v1  ;;  %386 = vst.msk [vmem:[#allocation2 + $0x170] sm:$0xff] %vm338_vm1, %v5444_v1  ;;  %v312_v51 = vmax.f32 %v280_v40, 0.0  ;;  %v313_v52 = vmax.f32 %v281_v41, 0.0  ;;  %v247_v53 = vmul.f32 %v5603_v5, %v209_v37  ;;  %v282_v54 = vadd.f32 %v5613_v6, %v244_v44  ;;  %v215_v63 = vld [vmem:[%s5608_s20 + $0x88] sm:$0xff]  ;;  %v216_v0 = vld [vmem:[%s5608_s20 + $0x90] sm:$0xff] }
  0x26   : > { %388 = vst.msk [vmem:[#allocation2 + $0x180] sm:$0xff] %vm338_vm1, %v5444_v1  ;;  %389 = vst.msk [vmem:[#allocation2 + $0x188] sm:$0xff] %vm338_vm1, %v5444_v1  ;;  %v283_v55 = vadd.f32 %v5613_v6, %v245_v45  ;;  %v284_v56 = vadd.f32 %v5613_v6, %v246_v46  ;;  %v248_v57 = vmul.f32 %v5603_v5, %v210_v42  ;;  %v217_v9 = vld [vmem:[%s5608_s20 + $0x98] sm:$0xff]  ;;  %v218_v19 = vld [vmem:[%s5608_s20 + $0xa0] sm:$0xff] }
  0x27   : > { %391 = vst.msk [vmem:[#allocation2 + $0x198] sm:$0xff] %vm338_vm1, %v5444_v1  ;;  %392 = vst.msk [vmem:[#allocation2 + $0x1a0] sm:$0xff] %vm338_vm1, %v5444_v1  ;;  %v285_v58 = vadd.f32 %v5613_v6, %v247_v53  ;;  %v249_v59 = vmul.f32 %v5603_v5, %v211_v47  ;;  %v250_v60 = vmul.f32 %v5603_v5, %v212_v48  ;;  %v219_v20 = vld [vmem:[%s5608_s20 + $0xa8] sm:$0xff]  ;;  %v220_v21 = vld [vmem:[%s5608_s20 + $0xb0] sm:$0xff] }
  0x28   : > { %342 = vst.msk [vmem:[#allocation2 + $0x10] sm:$0x3] %vm341_vm2, %v5444_v1  ;;  %345 = vst.msk [vmem:[#allocation2 + $0x28] sm:$0x3] %vm341_vm2, %v5444_v1  ;;  %v251_v61 = vmul.f32 %v5603_v5, %v213_v49  ;;  %v316_v7 = vmax.f32 %v284_v56, 0.0  ;;  %v286_v8 = vadd.f32 %v5613_v6, %v248_v57  ;;  %v252_v16 = vmul.f32 %v5603_v5, %v214_v62  ;;  %v222_v37 = vld [vmem:[%s5608_s20 + $0xc0] sm:$0xff] }
  0x29   : > { %348 = vst.msk [vmem:[#allocation2 + $0x40] sm:$0x3] %vm341_vm2, %v5444_v1  ;;  %351 = vst.msk [vmem:[#allocation2 + $0x58] sm:$0x3] %vm341_vm2, %v5444_v1  ;;  %v317_v11 = vmax.f32 %v285_v58, 0.0  ;;  %v288_v13 = vadd.f32 %v5613_v6, %v250_v60  ;;  %v253_v17 = vmul.f32 %v5603_v5, %v215_v63  ;;  %v254_v18 = vmul.f32 %v5603_v5, %v216_v0  ;;  %v224_v39 = vld [vmem:[%s5608_s20 + $0xd0] sm:$0xff] }
  0x2a   : > { %354 = vst.msk [vmem:[#allocation2 + $0x70] sm:$0x3] %vm341_vm2, %v5444_v1  ;;  %357 = vst.msk [vmem:[#allocation2 + $0x88] sm:$0x3] %vm341_vm2, %v5444_v1  ;;  %v289_v14 = vadd.f32 %v5613_v6, %v251_v61  ;;  %v318_v15 = vmax.f32 %v286_v8, 0.0  ;;  %v255_v28 = vmul.f32 %v5603_v5, %v217_v9  ;;  %v290_v29 = vadd.f32 %v5613_v6, %v252_v16  ;;  %v225_v45 = vld [vmem:[%s5608_s20 + $0xd8] sm:$0xff] }
  0x2b   : > { %360 = vst.msk [vmem:[#allocation2 + $0xa0] sm:$0x3] %vm341_vm2, %v5444_v1  ;;  %363 = vst.msk [vmem:[#allocation2 + $0xb8] sm:$0x3] %vm341_vm2, %v5444_v1  ;;  %v320_v26 = vmax.f32 %v288_v13, 0.0  ;;  %v291_v31 = vadd.f32 %v5613_v6, %v253_v17  ;;  %v292_v32 = vadd.f32 %v5613_v6, %v254_v18  ;;  %v257_v36 = vmul.f32 %v5603_v5, %v219_v20  ;;  %v228_v60 = vld [vmem:[%s5608_s20 + $0xf0] sm:$0xff] }
  0x2c   : > { %366 = vst.msk [vmem:[#allocation2 + $0xd0] sm:$0x3] %vm341_vm2, %v5444_v1  ;;  %369 = vst.msk [vmem:[#allocation2 + $0xe8] sm:$0x3] %vm341_vm2, %v5444_v1  ;;  %v321_v27 = vmax.f32 %v289_v14, 0.0  ;;  %v322_v41 = vmax.f32 %v290_v29, 0.0  ;;  %v258_v44 = vmul.f32 %v5603_v5, %v220_v21  ;;  %v262_v53 = vmul.f32 %v5603_v5, %v224_v39 }
  0x2d   : > { %372 = vst.msk [vmem:[#allocation2 + $0x100] sm:$0x3] %vm341_vm2, %v5444_v1  ;;  %375 = vst.msk [vmem:[#allocation2 + $0x118] sm:$0x3] %vm341_vm2, %v5444_v1  ;;  %v5705_v30 = vld [vmem:[%s6592_s3 + $0x18] sm:$0xf]  ;;  %v295_v48 = vadd.f32 %v5613_v6, %v257_v36  ;;  %v266_v16 = vmul.f32 %v5603_v5, %v228_v60 }
  0x2e   : > { %378 = vst.msk [vmem:[#allocation2 + $0x130] sm:$0x3] %vm341_vm2, %v5444_v1  ;;  %381 = vst.msk [vmem:[#allocation2 + $0x148] sm:$0x3] %vm341_vm2, %v5444_v1  ;;  %v323_v42 = vmax.f32 %v291_v31, 0.0 }
  0x2f   : > { %384 = vst.msk [vmem:[#allocation2 + $0x160] sm:$0x3] %vm341_vm2, %v5444_v1  ;;  %387 = vst.msk [vmem:[#allocation2 + $0x178] sm:$0x3] %vm341_vm2, %v5444_v1  ;;  %v461_v12 = vld [vmem:[#allocation2 + $0x9] sm:$0xff]  ;;  %v327_v57 = vmax.f32 %v295_v48, 0.0 }
  0x30   : > { %390 = vst.msk [vmem:[#allocation2 + $0x190] sm:$0x3] %vm341_vm2, %v5444_v1  ;;  %393 = vst.msk [vmem:[#allocation2 + $0x1a8] sm:$0x3] %vm341_vm2, %v5444_v1  ;;  %4635 = vmatmul.mubr.msk.f32.vlgmr.msra.gmra.mrb[0].mxu1 %vm338_vm1, %v461_v12  ;;  %v314_v1 = vmax.f32 %v282_v54, 0.0  ;;  %v287_v12 = vadd.f32 %v5613_v6, %v249_v59  ;;  %v226_v54 = vld [vmem:[%s5608_s20 + $0xe0] sm:$0xff]  ;;  %v263_v59 = vmul.f32 %v5603_v5, %v225_v45 }
  0x31   : > { %4683 = vmatpush3.msk.msra.mxu1 %vm590_vm0, %v459_v3  ;;  %395 = vst.msk [vmem:[#allocation2 + $0x19] sm:$0xff] %vm338_vm1, %v306_v33  ;;  %396 = vst.msk [vmem:[#allocation2 + $0x21] sm:$0xff] %vm338_vm1, %v307_v34  ;;  %v315_v3 = vmax.f32 %v283_v55, 0.0  ;;  %v221_v33 = vld [vmem:[%s5608_s20 + $0xb8] sm:$0xff]  ;;  %v293_v34 = vadd.f32 %v5613_v6, %v255_v28  ;;  %v227_v55 = vld [vmem:[%s5608_s20 + $0xe8] sm:$0xff] }
  0x32   : > { %4732 = vmatprep.subr.msk.mxu1 %vm590_vm0, %v5621_v10  ;;  %397 = vst.msk [vmem:[#allocation2 + $0x31] sm:$0xff] %vm338_vm1, %v308_v35  ;;  %398 = vst.msk [vmem:[#allocation2 + $0x39] sm:$0xff] %vm338_vm1, %v309_v38  ;;  %v319_v25 = vmax.f32 %v287_v12, 0.0  ;;  %v256_v35 = vmul.f32 %v5603_v5, %v218_v19  ;;  %v223_v38 = vld [vmem:[%s5608_s20 + $0xc8] sm:$0xff]  ;;  %v259_v49 = vmul.f32 %v5603_v5, %v221_v33 }
  0x33   : > { %399 = vst.msk [vmem:[#allocation2 + $0x49] sm:$0xff] %vm338_vm1, %v310_v43  ;;  %400 = vst.msk [vmem:[#allocation2 + $0x51] sm:$0xff] %vm338_vm1, %v311_v50  ;;  %v324_v43 = vmax.f32 %v292_v32, 0.0  ;;  %v296_v50 = vadd.f32 %v5613_v6, %v258_v44  ;;  %v301_v9 = vadd.f32 %v5613_v6, %v263_v59  ;;  %v265_v12 = vmul.f32 %v5603_v5, %v227_v55 }
  0x34   : > { %401 = vst.msk [vmem:[#allocation2 + $0x61] sm:$0xff] %vm338_vm1, %v312_v51  ;;  %402 = vst.msk [vmem:[#allocation2 + $0x69] sm:$0xff] %vm338_vm1, %v313_v52  ;;  %v294_v47 = vadd.f32 %v5613_v6, %v256_v35  ;;  %v260_v51 = vmul.f32 %v5603_v5, %v222_v37  ;;  %v261_v52 = vmul.f32 %v5603_v5, %v223_v38 }
  0x35   : > { %403 = vst.msk [vmem:[#allocation2 + $0x79] sm:$0xff] %vm338_vm1, %v314_v1  ;;  %404 = vst.msk [vmem:[#allocation2 + $0x81] sm:$0xff] %vm338_vm1, %v315_v3  ;;  %v297_v58 = vadd.f32 %v5613_v6, %v259_v49  ;;  %v328_v62 = vmax.f32 %v296_v50, 0.0  ;;  %v300_v1 = vadd.f32 %v5613_v6, %v262_v53  ;;  %v229_v3 = vld [vmem:[%s5608_s20 + $0xf8] sm:$0xff]  ;;  %v333_v17 = vmax.f32 %v301_v9, 0.0  ;;  %v428_v9 = vld [vmem:[#allocation2 + $0x8] sm:$0xff] }
  0x36   : > { %405 = vst.msk [vmem:[#allocation2 + $0x91] sm:$0xff] %vm338_vm1, %v316_v7  ;;  %406 = vst.msk [vmem:[#allocation2 + $0x99] sm:$0xff] %vm338_vm1, %v317_v11  ;;  %v326_v56 = vmax.f32 %v294_v47, 0.0  ;;  %v298_v63 = vadd.f32 %v5613_v6, %v260_v51  ;;  %v299_v0 = vadd.f32 %v5613_v6, %v261_v52  ;;  %v264_v11 = vmul.f32 %v5603_v5, %v226_v54  ;;  %s4334_s20 = sshll.u32 %s5492_s19, 8  ;;  %s5384_s19 = sshll.u32 %s5445_s30, 4  ;;  %s5385_s19 = int_to_ptr.vmem [resolvable:$false] %s5384_s19 }
  0x37   : > { %407 = vst.msk [vmem:[#allocation2 + $0xa9] sm:$0xff] %vm338_vm1, %v318_v15  ;;  %408 = vst.msk [vmem:[#allocation2 + $0xb1] sm:$0xff] %vm338_vm1, %v319_v25  ;;  %v329_v8 = vmax.f32 %v297_v58, 0.0  ;;  %v332_v15 = vmax.f32 %v300_v1, 0.0  ;;  %v303_v19 = vadd.f32 %v5613_v6, %v265_v12  ;;  %v267_v20 = vmul.f32 %v5603_v5, %v229_v3  ;;  %v427_v3 = vld [vmem:[#allocation2] sm:$0xff]  ;;  %s6549_s27 = scalar_lea.hbm %s6593_s4, %s4334_s20  ;;  %s5386_s5 = scalar_lea.vmem %s5385_s19, 512 }
  0x38   : > { %v462_v22 = vld [vmem:[#allocation2 + $0x19] sm:$0xff]  ;;  %v463_v23 = vld [vmem:[#allocation2 + $0x21] sm:$0xff]  ;;  %409 = vst.msk [vmem:[#allocation2 + $0xc1] sm:$0xff] %vm338_vm1, %v320_v26  ;;  %410 = vst.msk [vmem:[#allocation2 + $0xc9] sm:$0xff] %vm338_vm1, %v321_v27  ;;  %v330_v13 = vmax.f32 %v298_v63, 0.0  ;;  %v331_v14 = vmax.f32 %v299_v0, 0.0  ;;  %v302_v18 = vadd.f32 %v5613_v6, %v264_v11  ;;  %p5387_p0 = scmp.lt.s32.totalorder %s6544_s14, %s5385_s19  ;;  %p5388_p1 = scmp.lt.s32.totalorder %s5386_s5, %s5380_s29 }
  0x39   : > { %v5694_v24 = vld [vmem:[#allocation2 + $0x31] sm:$0xff]  ;;  %4637 = vmatprep.mubr.msk.f32.mxu1 %vm338_vm1, %v462_v22  ;;  %4834 = vmatprep.mubr.msk.f32.mxu0 %vm338_vm1, %v462_v22  ;;  %v5725_v40 = vld [vmem:[#allocation2 + $0x39] sm:$0xff]  ;;  %411 = vst.msk [vmem:[#allocation2 + $0xd9] sm:$0xff] %vm338_vm1, %v322_v41  ;;  %412 = vst.msk [vmem:[#allocation2 + $0xe1] sm:$0xff] %vm338_vm1, %v323_v42  ;;  %v304_v22 = vadd.f32 %v5613_v6, %v266_v16  ;;  %v335_v25 = vmax.f32 %v303_v19, 0.0  ;;  %v305_v26 = vadd.f32 %v5613_v6, %v267_v20 }
  0x3a   : > { %4638 = vmatmul.mubr.msk.f32.gmra.mrb[2].mxu1 %vm338_vm1, %v463_v23  ;;  %4835 = vmatmul.mubr.msk.f32.vlgmr.msra.gmra.mrb[0].mxu0 %vm338_vm1, %v463_v23  ;;  %v5731_v46 = vld [vmem:[#allocation2 + $0x49] sm:$0xff]  ;;  %413 = vst.msk [vmem:[#allocation2 + $0xf1] sm:$0xff] %vm338_vm1, %v324_v43  ;;  %v5759_v61 = vld [vmem:[#allocation2 + $0x51] sm:$0xff]  ;;  %415 = vst.msk [vmem:[#allocation2 + $0x109] sm:$0xff] %vm338_vm1, %v326_v56  ;;  %v334_v5 = vmax.f32 %v302_v18, 0.0  ;;  %p5389_p2 = por %p5388_p1, %p5387_p0 }
  0x3b   : > { %4883 = vmatpush3.msk.msra.mxu0 %vm590_vm0, %v5592_v4  ;;  %4640 = vmatprep.mubr.msk.f32.mxu1 %vm338_vm1, %v5694_v24  ;;  %v325_v4 = vmax.f32 %v293_v34, 0.0  ;;  %v5765_v7 = vld [vmem:[#allocation2 + $0x61] sm:$0xff]  ;;  %416 = vst.msk [vmem:[#allocation2 + $0x111] sm:$0xff] %vm338_vm1, %v327_v57  ;;  %417 = vst.msk [vmem:[#allocation2 + $0x121] sm:$0xff] %vm338_vm1, %v328_v62  ;;  %v5786_v21 = vld [vmem:[#allocation2 + $0x69] sm:$0xff]  ;;  %v336_v27 = vmax.f32 %v304_v22, 0.0 }
  0x3c   : > { %4837 = vmatprep.mubr.msk.f32.mxu0 %vm338_vm1, %v5694_v24  ;;  %4932 = vmatprep.subr.msk.mxu0 %vm590_vm0, %v5705_v30  ;;  %418 = vst.msk [vmem:[#allocation2 + $0x129] sm:$0xff] %vm338_vm1, %v329_v8  ;;  %419 = vst.msk [vmem:[#allocation2 + $0x139] sm:$0xff] %vm338_vm1, %v330_v13  ;;  %v5792_v23 = vld [vmem:[#allocation2 + $0x79] sm:$0xff]  ;;  %v337_v28 = vmax.f32 %v305_v26, 0.0  ;;  %v5806_v29 = vld [vmem:[#allocation2 + $0x81] sm:$0xff]  ;;  %p5390_p3 = pnand %p5389_p2, %p5383_p13 }
  0x3d   : > { %414 = vst.msk [vmem:[#allocation2 + $0xf9] sm:$0xff] %vm338_vm1, %v325_v4  ;;  %420 = vst.msk [vmem:[#allocation2 + $0x141] sm:$0xff] %vm338_vm1, %v331_v14  ;;  %v5809_v6 = vld [vmem:[#allocation2 + $0x91] sm:$0xff]  ;;  %v5820_v31 = vld [vmem:[#allocation2 + $0x99] sm:$0xff] }
  0x3e   : > { %4641 = vmatmul.mubr.msk.f32.gmra.mrb[4].mxu1 %vm338_vm1, %v5725_v40  ;;  %4838 = vmatmul.mubr.msk.f32.gmra.mrb[2].mxu0 %vm338_vm1, %v5725_v40  ;;  %421 = vst.msk [vmem:[#allocation2 + $0x151] sm:$0xff] %vm338_vm1, %v332_v15  ;;  %422 = vst.msk [vmem:[#allocation2 + $0x159] sm:$0xff] %vm338_vm1, %v333_v17  ;;  %v5822_v32 = vld [vmem:[#allocation2 + $0xa9] sm:$0xff]  ;;  %v5832_v33 = vld [vmem:[#allocation2 + $0xb1] sm:$0xff] }
  0x3f   : > { %4643 = vmatprep.mubr.msk.f32.mxu1 %vm338_vm1, %v5731_v46  ;;  %4840 = vmatprep.mubr.msk.f32.mxu0 %vm338_vm1, %v5731_v46  ;;  %423 = vst.msk [vmem:[#allocation2 + $0x169] sm:$0xff] %vm338_vm1, %v334_v5  ;;  %424 = vst.msk [vmem:[#allocation2 + $0x171] sm:$0xff] %vm338_vm1, %v335_v25  ;;  %v5834_v34 = vld [vmem:[#allocation2 + $0xc1] sm:$0xff]  ;;  %v5844_v35 = vld [vmem:[#allocation2 + $0xc9] sm:$0xff] }
  0x40   : > { %425 = vst.msk [vmem:[#allocation2 + $0x181] sm:$0xff] %vm338_vm1, %v336_v27  ;;  %426 = vst.msk [vmem:[#allocation2 + $0x189] sm:$0xff] %vm338_vm1, %v337_v28  ;;  %v5846_v36 = vld [vmem:[#allocation2 + $0xd9] sm:$0xff]  ;;  %v5858_v38 = vld [vmem:[#allocation2 + $0xe1] sm:$0xff] }
  0x41   : > { %6638 = vst [vmem:[#allocation6_spill] sm:$0xff] %v5844_v35  ;;  %6639 = vst [vmem:[#allocation7_spill] sm:$0xff] %v5846_v36  ;;  %v5848_v37 = vld [vmem:[#allocation2 + $0x1a] sm:$0xff]  ;;  %v5860_v39 = vld [vmem:[#allocation2 + $0x22] sm:$0xff] }
  0x42   : > { %4644 = vmatmul.mubr.msk.f32.gmra.mrb[6].mxu1 %vm338_vm1, %v5759_v61  ;;  %4841 = vmatmul.mubr.msk.f32.gmra.mrb[4].mxu0 %vm338_vm1, %v5759_v61  ;;  %6640 = vst [vmem:[#allocation8_spill] sm:$0xff] %v5858_v38  ;;  %v5862_v41 = vld [vmem:[#allocation2 + $0xf1] sm:$0xff]  ;;  %v5869_v43 = vld [vmem:[%s6592_s3 + $0x1c] sm:$0xf]  ;;  %v5885_v4 = vld [vmem:[#allocation2 + $0x109] sm:$0xff] }
  0x43   : > { %4646 = vmatprep.mubr.msk.f32.mxu1 %vm338_vm1, %v5765_v7  ;;  %4843 = vmatprep.mubr.msk.f32.mxu0 %vm338_vm1, %v5765_v7  ;;  %6641 = vst [vmem:[#allocation9_spill] sm:$0xff] %v5862_v41  ;;  %v5864_v42 = vld [vmem:[#allocation2 + $0x32] sm:$0xff]  ;;  %v5881_v45 = vld [vmem:[#allocation2 + $0x3a] sm:$0xff]  ;;  %6643 = vst [vmem:[#allocation11_spill] sm:$0xff] %v5885_v4 }
  0x44   : > { %v5879_v44 = vld [vmem:[#allocation2 + $0xf9] sm:$0xff]  ;;  %v5887_v47 = vld [vmem:[#allocation2 + $0x4a] sm:$0xff]  ;;  %v5903_v49 = vld [vmem:[#allocation2 + $0x121] sm:$0xff] }
  0x45   : > { %6642 = vst [vmem:[#allocation10_spill] sm:$0xff] %v5879_v44  ;;  %v5901_v48 = vld [vmem:[#allocation2 + $0x52] sm:$0xff]  ;;  %6645 = vst [vmem:[#allocation13_spill] sm:$0xff] %v5903_v49  ;;  %v5905_v50 = vld [vmem:[#allocation2 + $0x62] sm:$0xff] }
  0x46   : > { %4647 = vmatmul.mubr.msk.f32.gmra.mrb[8].mxu1 %vm338_vm1, %v5786_v21  ;;  %4844 = vmatmul.mubr.msk.f32.gmra.mrb[6].mxu0 %vm338_vm1, %v5786_v21  ;;  %v5915_v51 = vld [vmem:[#allocation2 + $0x129] sm:$0xff]  ;;  %v5919_v53 = vld [vmem:[#allocation2 + $0x139] sm:$0xff]  ;;  %v5931_v55 = vld [vmem:[#allocation2 + $0x141] sm:$0xff] }
  0x47   : > { %4649 = vmatprep.mubr.msk.f32.mxu1 %vm338_vm1, %v5792_v23  ;;  %4846 = vmatprep.mubr.msk.f32.mxu0 %vm338_vm1, %v5792_v23  ;;  %6646 = vst [vmem:[#allocation14_spill] sm:$0xff] %v5915_v51  ;;  %v5917_v52 = vld [vmem:[#allocation2 + $0x6a] sm:$0xff]  ;;  %6647 = vst [vmem:[#allocation15_spill] sm:$0xff] %v5919_v53  ;;  %v5921_v54 = vld [vmem:[#allocation2 + $0x7a] sm:$0xff] }
  0x48   : > { %6648 = vst [vmem:[#allocation16_spill] sm:$0xff] %v5931_v55  ;;  %v5933_v56 = vld [vmem:[#allocation2 + $0x82] sm:$0xff]  ;;  %v5935_v57 = vld [vmem:[#allocation2 + $0x151] sm:$0xff]  ;;  %v5947_v59 = vld [vmem:[#allocation2 + $0x159] sm:$0xff] }
  0x49   : > { %6649 = vst [vmem:[#allocation17_spill] sm:$0xff] %v5935_v57  ;;  %v5937_v58 = vld [vmem:[#allocation2 + $0x92] sm:$0xff]  ;;  %6650 = vst [vmem:[#allocation18_spill] sm:$0xff] %v5947_v59  ;;  %v5949_v60 = vld [vmem:[#allocation2 + $0x9a] sm:$0xff] }
  0x4a   : > { %4650 = vmatmul.mubr.msk.f32.gmra.mrb[10].mxu1 %vm338_vm1, %v5806_v29  ;;  %4847 = vmatmul.mubr.msk.f32.gmra.mrb[8].mxu0 %vm338_vm1, %v5806_v29  ;;  %v5951_v62 = vld [vmem:[#allocation2 + $0x169] sm:$0xff]  ;;  %v5963_v0 = vld [vmem:[#allocation2 + $0x171] sm:$0xff]  ;;  %v5980_v13 = vld [vmem:[#allocation2 + $0xda] sm:$0xff] }
  0x4b   : > { %4652 = vmatprep.mubr.msk.f32.mxu1 %vm338_vm1, %v5809_v6  ;;  %4849 = vmatprep.mubr.msk.f32.mxu0 %vm338_vm1, %v5809_v6  ;;  %6651 = vst [vmem:[#allocation19_spill] sm:$0xff] %v5951_v62  ;;  %v5953_v63 = vld [vmem:[#allocation2 + $0xaa] sm:$0xff]  ;;  %6652 = vst [vmem:[#allocation20_spill] sm:$0xff] %v5963_v0  ;;  %v5965_v1 = vld [vmem:[#allocation2 + $0xb2] sm:$0xff] }
  0x4c   : > { %v5967_v8 = vld [vmem:[#allocation2 + $0xc2] sm:$0xff]  ;;  %v5976_v11 = vld [vmem:[#allocation2 + $0xca] sm:$0xff]  ;;  %v5978_v12 = vld [vmem:[#allocation2 + $0x18] sm:$0xff] }
  0x4d   : > { %6653 = vst [vmem:[#allocation21_spill] sm:$0xff] %v5978_v12  ;;  %v5988_v14 = vld [vmem:[%s6592_s3 + $0xc] sm:$0xf]  ;;  %v5994_v15 = vld [vmem:[#allocation2 + $0x20] sm:$0xff]  ;;  %v6000_v17 = vld [vmem:[#allocation2 + $0x30] sm:$0xff] }
  0x4e   : > { %4653 = vmatmul.mubr.msk.f32.gmra.mrb[12].mxu1 %vm338_vm1, %v5820_v31  ;;  %4850 = vmatmul.mubr.msk.f32.gmra.mrb[10].mxu0 %vm338_vm1, %v5820_v31  ;;  %6654 = vst [vmem:[#allocation22_spill] sm:$0xff] %v5994_v15  ;;  %v5996_v16 = vld [vmem:[#allocation2 + $0xe2] sm:$0xff]  ;;  %6655 = vst [vmem:[#allocation23_spill] sm:$0xff] %v6000_v17  ;;  %v6002_v18 = vld [vmem:[#allocation2 + $0xf2] sm:$0xff] }
  0x4f   : > { %4655 = vmatprep.mubr.msk.f32.mxu1 %vm338_vm1, %v5822_v32  ;;  %4852 = vmatprep.mubr.msk.f32.mxu0 %vm338_vm1, %v5822_v32  ;;  %v6016_v19 = vld [vmem:[#allocation2 + $0xfa] sm:$0xff]  ;;  %v6018_v20 = vld [vmem:[#allocation2 + $0x48] sm:$0xff]  ;;  %v6030_v5 = vld [vmem:[#allocation2 + $0x50] sm:$0xff] }
  0x50   : > { %6657 = vst [vmem:[#allocation25_spill] sm:$0xff] %v6018_v20  ;;  %v6020_v22 = vld [vmem:[#allocation2 + $0x10a] sm:$0xff]  ;;  %6658 = vst [vmem:[#allocation26_spill] sm:$0xff] %v6030_v5  ;;  %v6032_v25 = vld [vmem:[#allocation2 + $0x112] sm:$0xff] }
  0x51   : > { %v6034_v26 = vld [vmem:[#allocation2 + $0x60] sm:$0xff]  ;;  %v6046_v28 = vld [vmem:[#allocation2 + $0x68] sm:$0xff] }
  0x52   : > { %4656 = vmatmul.mubr.msk.f32.gmra.mrb[14].mxu1 %vm338_vm1, %v5832_v33  ;;  %4853 = vmatmul.mubr.msk.f32.gmra.mrb[12].mxu0 %vm338_vm1, %v5832_v33  ;;  %6659 = vst [vmem:[#allocation27_spill] sm:$0xff] %v6034_v26  ;;  %v6036_v27 = vld [vmem:[#allocation2 + $0x122] sm:$0xff]  ;;  %6660 = vst [vmem:[#allocation28_spill] sm:$0xff] %v6046_v28 }
  0x53   : > { %4658 = vmatprep.mubr.msk.f32.mxu1 %vm338_vm1, %v5834_v34  ;;  %4855 = vmatprep.mubr.msk.f32.mxu0 %vm338_vm1, %v5834_v34 }
  0x56   : > { %4659 = vmatmul.mubr.msk.f32.gmra.mrb[16].mxu1 %vm338_vm1, %v5844_v35  ;;  %4856 = vmatmul.mubr.msk.f32.gmra.mrb[14].mxu0 %vm338_vm1, %v5844_v35  ;;  %v6124_v35 = vld [vmem:[#allocation2 + $0xe0] sm:$0xff] }
  0x57   : > { %4661 = vmatprep.mubr.msk.f32.mxu1 %vm338_vm1, %v5846_v36  ;;  %4884 = vmatprep.mubr.msk.f32.mxu0 %vm338_vm1, %v5848_v37  ;;  %v6112_v36 = vld [vmem:[#allocation2 + $0x18a] sm:$0xff] }
  0x58   : > { %6668 = vst [vmem:[#allocation36_spill] sm:$0xff] %v6112_v36 }
  0x5a   : > { %4662 = vmatmul.mubr.msk.f32.gmra.mrb[18].mxu1 %vm338_vm1, %v5858_v38  ;;  %4885 = vmatmul.mubr.msk.f32.vlgmr.msra.gmra.mrb[0].mxu0 %vm338_vm1, %v5860_v39  ;;  %v6100_v38 = vld [vmem:[#allocation2 + $0x182] sm:$0xff] }
  0x5b   : > { %4933 = vmatpush3.msk.msra.mxu0 %vm590_vm0, %v5705_v30  ;;  %4664 = vmatprep.mubr.msk.f32.mxu1 %vm338_vm1, %v5862_v41  ;;  %v5899_v30 = vld [vmem:[#allocation2 + $0x111] sm:$0xff]  ;;  %v6098_v41 = vld [vmem:[#allocation2 + $0xc0] sm:$0xff]  ;;  %6667 = vst [vmem:[#allocation35_spill] sm:$0xff] %v6100_v38 }
  0x5c   : > { %4887 = vmatprep.mubr.msk.f32.mxu0 %vm338_vm1, %v5864_v42  ;;  %4982 = vmatprep.subr.msk.mxu0 %vm590_vm0, %v5869_v43  ;;  %6644 = vst [vmem:[#allocation12_spill] sm:$0xff] %v5899_v30 }
  0x5e   : > { %4665 = vmatmul.mubr.msk.f32.gmra.mrb[20].mxu1 %vm338_vm1, %v5879_v44  ;;  %4888 = vmatmul.mubr.msk.f32.gmra.mrb[2].mxu0 %vm338_vm1, %v5881_v45  ;;  %v6096_v44 = vld [vmem:[#allocation2 + $0x172] sm:$0xff] }
  0x5f   : > { %4667 = vmatprep.mubr.msk.f32.mxu1 %vm338_vm1, %v5885_v4  ;;  %4890 = vmatprep.mubr.msk.f32.mxu0 %vm338_vm1, %v5887_v47  ;;  %v6094_v4 = vld [vmem:[#allocation2 + $0xb0] sm:$0xff]  ;;  %6666 = vst [vmem:[#allocation34_spill] sm:$0xff] %v6096_v44 }
  0x60   : > { %6665 = vst [vmem:[#allocation33_spill] sm:$0xff] %v6094_v4 }
  0x62   : > { %4668 = vmatmul.mubr.msk.f32.gmra.mrb[22].mxu1 %vm338_vm1, %v5899_v30  ;;  %4891 = vmatmul.mubr.msk.f32.gmra.mrb[4].mxu0 %vm338_vm1, %v5901_v48  ;;  %v6084_v30 = vld [vmem:[#allocation2 + $0x16a] sm:$0xff] }
  0x63   : > { %4670 = vmatprep.mubr.msk.f32.mxu1 %vm338_vm1, %v5903_v49  ;;  %4893 = vmatprep.mubr.msk.f32.mxu0 %vm338_vm1, %v5905_v50  ;;  %v6082_v49 = vld [vmem:[#allocation2 + $0xa8] sm:$0xff] }
  0x66   : > { %4671 = vmatmul.mubr.msk.f32.gmra.mrb[24].mxu1 %vm338_vm1, %v5915_v51  ;;  %4894 = vmatmul.mubr.msk.f32.gmra.mrb[6].mxu0 %vm338_vm1, %v5917_v52  ;;  %v6080_v51 = vld [vmem:[#allocation2 + $0x15a] sm:$0xff] }
  0x67   : > { %4673 = vmatprep.mubr.msk.f32.mxu1 %vm338_vm1, %v5919_v53  ;;  %4896 = vmatprep.mubr.msk.f32.mxu0 %vm338_vm1, %v5921_v54  ;;  %v6078_v53 = vld [vmem:[#allocation2 + $0x98] sm:$0xff] }
  0x68   : > { %6664 = vst [vmem:[#allocation32_spill] sm:$0xff] %v6078_v53 }
  0x6a   : > { %4674 = vmatmul.mubr.msk.f32.gmra.mrb[26].mxu1 %vm338_vm1, %v5931_v55  ;;  %4897 = vmatmul.mubr.msk.f32.gmra.mrb[8].mxu0 %vm338_vm1, %v5933_v56  ;;  %v6068_v55 = vld [vmem:[#allocation2 + $0x152] sm:$0xff] }
  0x6b   : > { %4676 = vmatprep.mubr.msk.f32.mxu1 %vm338_vm1, %v5935_v57  ;;  %4899 = vmatprep.mubr.msk.f32.mxu0 %vm338_vm1, %v5937_v58  ;;  %v6066_v57 = vld [vmem:[#allocation2 + $0x90] sm:$0xff] }
  0x6c   : > { %6663 = vst [vmem:[#allocation31_spill] sm:$0xff] %v6066_v57 }
  0x6e   : > { %4677 = vmatmul.mubr.msk.f32.gmra.mrb[28].mxu1 %vm338_vm1, %v5947_v59  ;;  %4900 = vmatmul.mubr.msk.f32.gmra.mrb[10].mxu0 %vm338_vm1, %v5949_v60  ;;  %v6064_v59 = vld [vmem:[#allocation2 + $0x142] sm:$0xff] }
  0x6f   : > { %4679 = vmatprep.mubr.msk.f32.mxu1 %vm338_vm1, %v5951_v62  ;;  %4902 = vmatprep.mubr.msk.f32.mxu0 %vm338_vm1, %v5953_v63  ;;  %v6062_v62 = vld [vmem:[#allocation2 + $0x80] sm:$0xff] }
  0x70   : > { %6662 = vst [vmem:[#allocation30_spill] sm:$0xff] %v6062_v62 }
  0x72   : > { %4680 = vmatmul.mubr.msk.f32.gmra.mrb[30].mxu1 %vm338_vm1, %v5963_v0  ;;  %4903 = vmatmul.mubr.msk.f32.gmra.mrb[12].mxu0 %vm338_vm1, %v5965_v1  ;;  %v6052_v0 = vld [vmem:[#allocation2 + $0x13a] sm:$0xff] }
  0x73   : > { %4684 = vmatprep.mubr.msk.f32.mxu1 %vm338_vm1, %v427_v3  ;;  %4905 = vmatprep.mubr.msk.f32.mxu0 %vm338_vm1, %v5967_v8  ;;  %v6048_v3 = vld [vmem:[#allocation2 + $0x12a] sm:$0xff] }
  0x76   : > { %4685 = vmatmul.mubr.msk.f32.vlgmr.msra.gmra.mrb[0].mxu1 %vm338_vm1, %v428_v9  ;;  %4906 = vmatmul.mubr.msk.f32.gmra.mrb[14].mxu0 %vm338_vm1, %v5976_v11  ;;  %v6050_v9 = vld [vmem:[#allocation2 + $0x78] sm:$0xff] }
  0x77   : > { %4687 = vmatprep.mubr.msk.f32.mxu1 %vm338_vm1, %v5978_v12  ;;  %4908 = vmatprep.mubr.msk.f32.mxu0 %vm338_vm1, %v5980_v13  ;;  %6661 = vst [vmem:[#allocation29_spill] sm:$0xff] %v6050_v9  ;;  %v6114_v12 = vld [vmem:[#allocation2 + $0xd8] sm:$0xff] }
  0x78   : > { %4733 = vmatpush3.msk.msra.mxu1 %vm590_vm0, %v5621_v10  ;;  %v6014_v10 = vld [vmem:[#allocation2 + $0x38] sm:$0xff] }
  0x79   : > { %4782 = vmatprep.subr.msk.mxu1 %vm590_vm0, %v5988_v14  ;;  %6656 = vst [vmem:[#allocation24_spill] sm:$0xff] %v6014_v10 }
  0x7a   : > { %4688 = vmatmul.mubr.msk.f32.gmra.mrb[2].mxu1 %vm338_vm1, %v5994_v15  ;;  %4909 = vmatmul.mubr.msk.f32.gmra.mrb[16].mxu0 %vm338_vm1, %v5996_v16  ;;  %v6110_v15 = vld [vmem:[#allocation2 + $0xc8] sm:$0xff] }
  0x7b   : > { %4690 = vmatprep.mubr.msk.f32.mxu1 %vm338_vm1, %v6000_v17  ;;  %4911 = vmatprep.mubr.msk.f32.mxu0 %vm338_vm1, %v6002_v18 }
  0x7e   : > { %4691 = vmatmul.mubr.msk.f32.gmra.mrb[4].mxu1 %vm338_vm1, %v6014_v10  ;;  %4912 = vmatmul.mubr.msk.f32.gmra.mrb[18].mxu0 %vm338_vm1, %v6016_v19 }
  0x7f   : > { %4693 = vmatprep.mubr.msk.f32.mxu1 %vm338_vm1, %v6018_v20  ;;  %4914 = vmatprep.mubr.msk.f32.mxu0 %vm338_vm1, %v6020_v22 }
  0x82   : > { %4694 = vmatmul.mubr.msk.f32.gmra.mrb[6].mxu1 %vm338_vm1, %v6030_v5  ;;  %4915 = vmatmul.mubr.msk.f32.gmra.mrb[20].mxu0 %vm338_vm1, %v6032_v25 }
  0x83   : > { %4696 = vmatprep.mubr.msk.f32.mxu1 %vm338_vm1, %v6034_v26  ;;  %4917 = vmatprep.mubr.msk.f32.mxu0 %vm338_vm1, %v6036_v27 }
  0x86   : > { %4697 = vmatmul.mubr.msk.f32.gmra.mrb[8].mxu1 %vm338_vm1, %v6046_v28  ;;  %4918 = vmatmul.mubr.msk.f32.gmra.mrb[22].mxu0 %vm338_vm1, %v6048_v3 }
  0x87   : > { %4699 = vmatprep.mubr.msk.f32.mxu1 %vm338_vm1, %v6050_v9  ;;  %4920 = vmatprep.mubr.msk.f32.mxu0 %vm338_vm1, %v6052_v0 }
  0x8a   : > { %4700 = vmatmul.mubr.msk.f32.gmra.mrb[10].mxu1 %vm338_vm1, %v6062_v62  ;;  %4921 = vmatmul.mubr.msk.f32.gmra.mrb[24].mxu0 %vm338_vm1, %v6064_v59 }
  0x8b   : > { %4702 = vmatprep.mubr.msk.f32.mxu1 %vm338_vm1, %v6066_v57  ;;  %4923 = vmatprep.mubr.msk.f32.mxu0 %vm338_vm1, %v6068_v55 }
  0x8e   : > { %4703 = vmatmul.mubr.msk.f32.gmra.mrb[12].mxu1 %vm338_vm1, %v6078_v53  ;;  %4924 = vmatmul.mubr.msk.f32.gmra.mrb[26].mxu0 %vm338_vm1, %v6080_v51 }
  0x8f   : > { %4705 = vmatprep.mubr.msk.f32.mxu1 %vm338_vm1, %v6082_v49  ;;  %4926 = vmatprep.mubr.msk.f32.mxu0 %vm338_vm1, %v6084_v30 }
  0x92   : > { %4706 = vmatmul.mubr.msk.f32.gmra.mrb[14].mxu1 %vm338_vm1, %v6094_v4  ;;  %4927 = vmatmul.mubr.msk.f32.gmra.mrb[28].mxu0 %vm338_vm1, %v6096_v44  ;;  %v6131_v44 = vld [vmem:[%s6592_s3 + $0x20] sm:$0xf] }
  0x93   : > { %4708 = vmatprep.mubr.msk.f32.mxu1 %vm338_vm1, %v6098_v41  ;;  %4929 = vmatprep.mubr.msk.f32.mxu0 %vm338_vm1, %v6100_v38  ;;  %v6126_v38 = vld [vmem:[#allocation2 + $0xf0] sm:$0xff] }
  0x96   : > { %4709 = vmatmul.mubr.msk.f32.gmra.mrb[16].mxu1 %vm338_vm1, %v6110_v15  ;;  %4930 = vmatmul.mubr.msk.f32.gmra.mrb[30].mxu0 %vm338_vm1, %v6112_v36  ;;  %v6141_v36 = vld [vmem:[#allocation2 + $0xf8] sm:$0xff] }
  0x97   : > { %4711 = vmatprep.mubr.msk.f32.mxu1 %vm338_vm1, %v6114_v12  ;;  %4934 = vmatprep.mubr.msk.f32.mxu0 %vm338_vm1, %v6000_v17  ;;  %v6145_v17 = vld [vmem:[#allocation2 + $0x108] sm:$0xff] }
  0x9a   : > { %4712 = vmatmul.mubr.msk.f32.gmra.mrb[18].mxu1 %vm338_vm1, %v6124_v35  ;;  %4935 = vmatmul.mubr.msk.f32.vlgmr.msra.gmra.mrb[0].mxu0 %vm338_vm1, %v6014_v10  ;;  %v6171_v10 = vld [vmem:[#allocation2 + $0x138] sm:$0xff] }
  0x9b   : > { %4983 = vmatpush3.msk.msra.mxu0 %vm590_vm0, %v5869_v43  ;;  %4714 = vmatprep.mubr.msk.f32.mxu1 %vm338_vm1, %v6126_v38  ;;  %v6157_v43 = vld [vmem:[#allocation2 + $0x110] sm:$0xff] }
  0x9c   : > { %4937 = vmatprep.mubr.msk.f32.mxu0 %vm338_vm1, %v6018_v20  ;;  %5032 = vmatprep.subr.msk.mxu0 %vm590_vm0, %v6131_v44  ;;  %v6159_v20 = vld [vmem:[#allocation2 + $0x120] sm:$0xff] }
  0x9e   : > { %4715 = vmatmul.mubr.msk.f32.gmra.mrb[20].mxu1 %vm338_vm1, %v6141_v36  ;;  %4938 = vmatmul.mubr.msk.f32.gmra.mrb[2].mxu0 %vm338_vm1, %v6030_v5  ;;  %v6169_v5 = vld [vmem:[#allocation2 + $0x128] sm:$0xff] }
  0x9f   : > { %4717 = vmatprep.mubr.msk.f32.mxu1 %vm338_vm1, %v6145_v17  ;;  %4940 = vmatprep.mubr.msk.f32.mxu0 %vm338_vm1, %v6034_v26  ;;  %v6183_v26 = vld [vmem:[#allocation2 + $0x150] sm:$0xff] }
  0xa2   : > { %4718 = vmatmul.mubr.msk.f32.gmra.mrb[22].mxu1 %vm338_vm1, %v6157_v43  ;;  %4941 = vmatmul.mubr.msk.f32.gmra.mrb[4].mxu0 %vm338_vm1, %v6046_v28  ;;  %v6181_v28 = vld [vmem:[#allocation2 + $0x140] sm:$0xff] }
  0xa3   : > { %4720 = vmatprep.mubr.msk.f32.mxu1 %vm338_vm1, %v6159_v20  ;;  %4943 = vmatprep.mubr.msk.f32.mxu0 %vm338_vm1, %v6050_v9  ;;  %v6195_v9 = vld [vmem:[#allocation2 + $0x168] sm:$0xff] }
  0xa6   : > { %4721 = vmatmul.mubr.msk.f32.gmra.mrb[24].mxu1 %vm338_vm1, %v6169_v5  ;;  %4944 = vmatmul.mubr.msk.f32.gmra.mrb[6].mxu0 %vm338_vm1, %v6062_v62  ;;  %v6193_v62 = vld [vmem:[#allocation2 + $0x158] sm:$0xff] }
  0xa7   : > { %4723 = vmatprep.mubr.msk.f32.mxu1 %vm338_vm1, %v6171_v10  ;;  %4946 = vmatprep.mubr.msk.f32.mxu0 %vm338_vm1, %v6066_v57  ;;  %v1143_v57 = vld [vmem:[#allocation2 + $0x2] sm:$0xff] }
  0xaa   : > { %4724 = vmatmul.mubr.msk.f32.gmra.mrb[26].mxu1 %vm338_vm1, %v6181_v28  ;;  %4947 = vmatmul.mubr.msk.f32.gmra.mrb[8].mxu0 %vm338_vm1, %v6078_v53  ;;  %v6205_v53 = vld [vmem:[#allocation2 + $0x170] sm:$0xff] }
  0xab   : > { %4726 = vmatprep.mubr.msk.f32.mxu1 %vm338_vm1, %v6183_v26  ;;  %4949 = vmatprep.mubr.msk.f32.mxu0 %vm338_vm1, %v6082_v49 }
  0xae   : > { %4727 = vmatmul.mubr.msk.f32.gmra.mrb[28].mxu1 %vm338_vm1, %v6193_v62  ;;  %4950 = vmatmul.mubr.msk.f32.gmra.mrb[10].mxu0 %vm338_vm1, %v6094_v4  ;;  %v1144_v4 = vld [vmem:[#allocation2 + $0xa] sm:$0xff] }
  0xaf   : > { %4729 = vmatprep.mubr.msk.f32.mxu1 %vm338_vm1, %v6195_v9  ;;  %4952 = vmatprep.mubr.msk.f32.mxu0 %vm338_vm1, %v6098_v41 }
  0xb2   : > { %4730 = vmatmul.mubr.msk.f32.gmra.mrb[30].mxu1 %vm338_vm1, %v6205_v53  ;;  %4953 = vmatmul.mubr.msk.f32.gmra.mrb[12].mxu0 %vm338_vm1, %v6110_v15 }
  0xb3   : > { %4734 = vmatprep.mubr.msk.f32.mxu1 %vm338_vm1, %v1143_v57  ;;  %4955 = vmatprep.mubr.msk.f32.mxu0 %vm338_vm1, %v6114_v12  ;;  %v2735_v57 = vld [vmem:[#allocation2 + $0x1a0] sm:$0xff] }
  0xb6   : > { %4735 = vmatmul.mubr.msk.f32.vlgmr.msra.gmra.mrb[0].mxu1 %vm338_vm1, %v1144_v4  ;;  %4956 = vmatmul.mubr.msk.f32.gmra.mrb[14].mxu0 %vm338_vm1, %v6124_v35  ;;  %v2734_v4 = vld [vmem:[#allocation2 + $0x198] sm:$0xff] }
  0xb7   : > { %4737 = vmatprep.mubr.msk.f32.mxu1 %vm338_vm1, %v5848_v37  ;;  %4958 = vmatprep.mubr.msk.f32.mxu0 %vm338_vm1, %v6126_v38  ;;  %v6265_v37 = vld [vmem:[#allocation2 + $0x180] sm:$0xff] }
  0xb8   : > { %4783 = vmatpush3.msk.msra.mxu1 %vm590_vm0, %v5988_v14  ;;  %v6683_v14 = vld [vmem:[#allocation27_spill] sm:$0xff] }
  0xb9   : > { %5082 = vmatprep.subr.msk.mxu1 %vm590_vm0, %v5580_v2 }
  0xba   : > { %4738 = vmatmul.mubr.msk.f32.gmra.mrb[2].mxu1 %vm338_vm1, %v5860_v39  ;;  %4959 = vmatmul.mubr.msk.f32.gmra.mrb[16].mxu0 %vm338_vm1, %v6141_v36  ;;  %v6275_v39 = vld [vmem:[#allocation2 + $0x188] sm:$0xff] }
  0xbb   : > { %4740 = vmatprep.mubr.msk.f32.mxu1 %vm338_vm1, %v5864_v42  ;;  %4961 = vmatprep.mubr.msk.f32.mxu0 %vm338_vm1, %v6145_v17 }
  0xbe   : > { %4741 = vmatmul.mubr.msk.f32.gmra.mrb[4].mxu1 %vm338_vm1, %v5881_v45  ;;  %4962 = vmatmul.mubr.msk.f32.gmra.mrb[18].mxu0 %vm338_vm1, %v6157_v43 }
  0xbf   : > { %4743 = vmatprep.mubr.msk.f32.mxu1 %vm338_vm1, %v5887_v47  ;;  %4964 = vmatprep.mubr.msk.f32.mxu0 %vm338_vm1, %v6159_v20 }
  0xc2   : > { %4744 = vmatmul.mubr.msk.f32.gmra.mrb[6].mxu1 %vm338_vm1, %v5901_v48  ;;  %4965 = vmatmul.mubr.msk.f32.gmra.mrb[20].mxu0 %vm338_vm1, %v6169_v5 }
  0xc3   : > { %4746 = vmatprep.mubr.msk.f32.mxu1 %vm338_vm1, %v5905_v50  ;;  %4967 = vmatprep.mubr.msk.f32.mxu0 %vm338_vm1, %v6171_v10 }
  0xc6   : > { %4747 = vmatmul.mubr.msk.f32.gmra.mrb[8].mxu1 %vm338_vm1, %v5917_v52  ;;  %4968 = vmatmul.mubr.msk.f32.gmra.mrb[22].mxu0 %vm338_vm1, %v6181_v28 }
  0xc7   : > { %4749 = vmatprep.mubr.msk.f32.mxu1 %vm338_vm1, %v5921_v54  ;;  %4970 = vmatprep.mubr.msk.f32.mxu0 %vm338_vm1, %v6183_v26 }
  0xca   : > { %4750 = vmatmul.mubr.msk.f32.gmra.mrb[10].mxu1 %vm338_vm1, %v5933_v56  ;;  %4971 = vmatmul.mubr.msk.f32.gmra.mrb[24].mxu0 %vm338_vm1, %v6193_v62 }
  0xcb   : > { %4752 = vmatprep.mubr.msk.f32.mxu1 %vm338_vm1, %v5937_v58  ;;  %4973 = vmatprep.mubr.msk.f32.mxu0 %vm338_vm1, %v6195_v9 }
  0xce   : > { %4753 = vmatmul.mubr.msk.f32.gmra.mrb[12].mxu1 %vm338_vm1, %v5949_v60  ;;  %4974 = vmatmul.mubr.msk.f32.gmra.mrb[26].mxu0 %vm338_vm1, %v6205_v53 }
  0xcf   : > { %4755 = vmatprep.mubr.msk.f32.mxu1 %vm338_vm1, %v5953_v63  ;;  %4976 = vmatprep.mubr.msk.f32.mxu0 %vm338_vm1, %v6265_v37 }
  0xd2   : > { %4756 = vmatmul.mubr.msk.f32.gmra.mrb[14].mxu1 %vm338_vm1, %v5965_v1  ;;  %4977 = vmatmul.mubr.msk.f32.gmra.mrb[28].mxu0 %vm338_vm1, %v6275_v39 }
  0xd3   : > { %4758 = vmatprep.mubr.msk.f32.mxu1 %vm338_vm1, %v5967_v8  ;;  %4979 = vmatprep.mubr.msk.f32.mxu0 %vm338_vm1, %v2734_v4  ;;  %v6685_v4 = vld [vmem:[#allocation28_spill] sm:$0xff] }
  0xd6   : > { %4759 = vmatmul.mubr.msk.f32.gmra.mrb[16].mxu1 %vm338_vm1, %v5976_v11  ;;  %4980 = vmatmul.mubr.msk.f32.gmra.mrb[30].mxu0 %vm338_vm1, %v2735_v57  ;;  %v6686_v57 = vld [vmem:[#allocation14_spill] sm:$0xff] }
  0xd7   : > { %4761 = vmatprep.mubr.msk.f32.mxu1 %vm338_vm1, %v5980_v13  ;;  %4984 = vmatprep.mubr.msk.f32.mxu0 %vm338_vm1, %v5694_v24  ;;  %v6669_v24 = vld [vmem:[#allocation34_spill] sm:$0xff] }
  0xda   : > { %4762 = vmatmul.mubr.msk.f32.gmra.mrb[18].mxu1 %vm338_vm1, %v5996_v16  ;;  %4985 = vmatmul.mubr.msk.f32.vlgmr.msra.gmra.mrb[0].mxu0 %vm338_vm1, %v5725_v40  ;;  %v6670_v40 = vld [vmem:[#allocation6_spill] sm:$0xff] }
  0xdb   : > { %5033 = vmatpush3.msk.msra.mxu0 %vm590_vm0, %v6131_v44  ;;  %4764 = vmatprep.mubr.msk.f32.mxu1 %vm338_vm1, %v6002_v18  ;;  %v6682_v44 = vld [vmem:[#allocation12_spill] sm:$0xff] }
  0xdc   : > { %4987 = vmatprep.mubr.msk.f32.mxu0 %vm338_vm1, %v5731_v46  ;;  %v6671_v46 = vld [vmem:[#allocation21_spill] sm:$0xff] }
  0xde   : > { %4765 = vmatmul.mubr.msk.f32.gmra.mrb[20].mxu1 %vm338_vm1, %v6016_v19  ;;  %4988 = vmatmul.mubr.msk.f32.gmra.mrb[2].mxu0 %vm338_vm1, %v5759_v61  ;;  %v6672_v61 = vld [vmem:[#allocation7_spill] sm:$0xff] }
  0xdf   : > { %4767 = vmatprep.mubr.msk.f32.mxu1 %vm338_vm1, %v6020_v22  ;;  %4990 = vmatprep.mubr.msk.f32.mxu0 %vm338_vm1, %v5765_v7  ;;  %v6673_v7 = vld [vmem:[#allocation22_spill] sm:$0xff] }
  0xe2   : > { %4768 = vmatmul.mubr.msk.f32.gmra.mrb[22].mxu1 %vm338_vm1, %v6032_v25  ;;  %4991 = vmatmul.mubr.msk.f32.gmra.mrb[4].mxu0 %vm338_vm1, %v5786_v21  ;;  %v6674_v21 = vld [vmem:[#allocation8_spill] sm:$0xff] }
  0xe3   : > { %4770 = vmatprep.mubr.msk.f32.mxu1 %vm338_vm1, %v6036_v27  ;;  %4993 = vmatprep.mubr.msk.f32.mxu0 %vm338_vm1, %v5792_v23  ;;  %v6675_v23 = vld [vmem:[#allocation23_spill] sm:$0xff] }
  0xe6   : > { %4771 = vmatmul.mubr.msk.f32.gmra.mrb[24].mxu1 %vm338_vm1, %v6048_v3  ;;  %4994 = vmatmul.mubr.msk.f32.gmra.mrb[6].mxu0 %vm338_vm1, %v5806_v29  ;;  %v6676_v29 = vld [vmem:[#allocation9_spill] sm:$0xff] }
  0xe7   : > { %4773 = vmatprep.mubr.msk.f32.mxu1 %vm338_vm1, %v6052_v0  ;;  %4996 = vmatprep.mubr.msk.f32.mxu0 %vm338_vm1, %v5809_v6  ;;  %v6677_v6 = vld [vmem:[#allocation24_spill] sm:$0xff] }
  0xea   : > { %4774 = vmatmul.mubr.msk.f32.gmra.mrb[26].mxu1 %vm338_vm1, %v6064_v59  ;;  %4997 = vmatmul.mubr.msk.f32.gmra.mrb[8].mxu0 %vm338_vm1, %v5820_v31  ;;  %v6678_v31 = vld [vmem:[#allocation10_spill] sm:$0xff] }
  0xeb   : > { %4776 = vmatprep.mubr.msk.f32.mxu1 %vm338_vm1, %v6068_v55  ;;  %4999 = vmatprep.mubr.msk.f32.mxu0 %vm338_vm1, %v5822_v32  ;;  %v6679_v32 = vld [vmem:[#allocation25_spill] sm:$0xff] }
  0xee   : > { %4777 = vmatmul.mubr.msk.f32.gmra.mrb[28].mxu1 %vm338_vm1, %v6080_v51  ;;  %5000 = vmatmul.mubr.msk.f32.gmra.mrb[10].mxu0 %vm338_vm1, %v5832_v33  ;;  %v6680_v33 = vld [vmem:[#allocation11_spill] sm:$0xff] }
  0xef   : > { %4779 = vmatprep.mubr.msk.f32.mxu1 %vm338_vm1, %v6084_v30  ;;  %5002 = vmatprep.mubr.msk.f32.mxu0 %vm338_vm1, %v5834_v34  ;;  %v6681_v34 = vld [vmem:[#allocation26_spill] sm:$0xff] }
  0xf2   : > { %4780 = vmatmul.mubr.msk.f32.gmra.mrb[30].mxu1 %vm338_vm1, %v6669_v24  ;;  %5003 = vmatmul.mubr.msk.f32.gmra.mrb[12].mxu0 %vm338_vm1, %v6670_v40  ;;  %v6687_v40 = vld [vmem:[#allocation29_spill] sm:$0xff] }
  0xf3   : > { %4784 = vmatprep.mubr.msk.f32.mxu1 %vm338_vm1, %v6671_v46  ;;  %5005 = vmatprep.mubr.msk.f32.mxu0 %vm338_vm1, %v6672_v61  ;;  %v6688_v46 = vld [vmem:[#allocation15_spill] sm:$0xff]  ;;  %v6689_v61 = vld [vmem:[#allocation30_spill] sm:$0xff] }
  0xf6   : > { %4785 = vmatmul.mubr.msk.f32.vlgmr.msra.gmra.mrb[0].mxu1 %vm338_vm1, %v6673_v7  ;;  %5006 = vmatmul.mubr.msk.f32.gmra.mrb[14].mxu0 %vm338_vm1, %v6674_v21  ;;  %v6690_v7 = vld [vmem:[#allocation16_spill] sm:$0xff]  ;;  %v6691_v21 = vld [vmem:[#allocation31_spill] sm:$0xff] }
  0xf7   : > { %4787 = vmatprep.mubr.msk.f32.mxu1 %vm338_vm1, %v6675_v23  ;;  %5008 = vmatprep.mubr.msk.f32.mxu0 %vm338_vm1, %v6676_v29  ;;  %v6692_v23 = vld [vmem:[#allocation17_spill] sm:$0xff]  ;;  %v6693_v29 = vld [vmem:[#allocation32_spill] sm:$0xff] }
  0xf8   : > { %5083 = vmatpush3.msk.msra.mxu1 %vm590_vm0, %v5580_v2  ;;  %v6684_v2 = vld [vmem:[#allocation13_spill] sm:$0xff] }
  0xfa   : > { %4788 = vmatmul.mubr.msk.f32.gmra.mrb[2].mxu1 %vm338_vm1, %v6677_v6  ;;  %5009 = vmatmul.mubr.msk.f32.gmra.mrb[16].mxu0 %vm338_vm1, %v6678_v31  ;;  %v6694_v6 = vld [vmem:[#allocation18_spill] sm:$0xff]  ;;  %v6695_v31 = vld [vmem:[#allocation19_spill] sm:$0xff] }
  0xfb   : > { %4790 = vmatprep.mubr.msk.f32.mxu1 %vm338_vm1, %v6679_v32  ;;  %5011 = vmatprep.mubr.msk.f32.mxu0 %vm338_vm1, %v6680_v33  ;;  %v6399_v32 = vld [vmem:[#allocation2 + $0x181] sm:$0xff] }
  0xfe   : > { %4791 = vmatmul.mubr.msk.f32.gmra.mrb[4].mxu1 %vm338_vm1, %v6681_v34  ;;  %5012 = vmatmul.mubr.msk.f32.gmra.mrb[18].mxu0 %vm338_vm1, %v6682_v44  ;;  %v6696_v34 = vld [vmem:[#allocation33_spill] sm:$0xff] }
  0xff   : > { %4793 = vmatprep.mubr.msk.f32.mxu1 %vm338_vm1, %v6683_v14  ;;  %5014 = vmatprep.mubr.msk.f32.mxu0 %vm338_vm1, %v6684_v2  ;;  %v6697_v14 = vld [vmem:[#allocation20_spill] sm:$0xff] }
 0x102   : > { %4794 = vmatmul.mubr.msk.f32.gmra.mrb[6].mxu1 %vm338_vm1, %v6685_v4  ;;  %5015 = vmatmul.mubr.msk.f32.gmra.mrb[20].mxu0 %vm338_vm1, %v6686_v57  ;;  %v6409_v4 = vld [vmem:[#allocation2 + $0x189] sm:$0xff] }
 0x103   : > { %4796 = vmatprep.mubr.msk.f32.mxu1 %vm338_vm1, %v6687_v40  ;;  %5017 = vmatprep.mubr.msk.f32.mxu0 %vm338_vm1, %v6688_v46  ;;  %v3125_v40 = vld [vmem:[#allocation2 + $0x1a1] sm:$0xff] }
 0x106   : > { %4797 = vmatmul.mubr.msk.f32.gmra.mrb[8].mxu1 %vm338_vm1, %v6689_v61  ;;  %5018 = vmatmul.mubr.msk.f32.gmra.mrb[22].mxu0 %vm338_vm1, %v6690_v7 }
 0x107   : > { %4799 = vmatprep.mubr.msk.f32.mxu1 %vm338_vm1, %v6691_v21  ;;  %5020 = vmatprep.mubr.msk.f32.mxu0 %vm338_vm1, %v6692_v23 }
 0x10a   : > { %4800 = vmatmul.mubr.msk.f32.gmra.mrb[10].mxu1 %vm338_vm1, %v6693_v29  ;;  %5021 = vmatmul.mubr.msk.f32.gmra.mrb[24].mxu0 %vm338_vm1, %v6694_v6 }
 0x10b   : > { %4802 = vmatprep.mubr.msk.f32.mxu1 %vm338_vm1, %v6082_v49  ;;  %5023 = vmatprep.mubr.msk.f32.mxu0 %vm338_vm1, %v6695_v31  ;;  %v3124_v49 = vld [vmem:[#allocation2 + $0x199] sm:$0xff] }
 0x10e   : > { %4803 = vmatmul.mubr.msk.f32.gmra.mrb[12].mxu1 %vm338_vm1, %v6696_v34  ;;  %5024 = vmatmul.mubr.msk.f32.gmra.mrb[26].mxu0 %vm338_vm1, %v6697_v14 }
 0x10f   : > { %4805 = vmatprep.mubr.msk.f32.mxu1 %vm338_vm1, %v6098_v41  ;;  %5026 = vmatprep.mubr.msk.f32.mxu0 %vm338_vm1, %v6399_v32  ;;  %v1942_v41 = vld [vmem:[#allocation2 + $0xf9] sm:$0xff] }
 0x112   : > { %4806 = vmatmul.mubr.msk.f32.gmra.mrb[14].mxu1 %vm338_vm1, %v6110_v15  ;;  %5027 = vmatmul.mubr.msk.f32.gmra.mrb[28].mxu0 %vm338_vm1, %v6409_v4 }
 0x113   : > { %4808 = vmatprep.mubr.msk.f32.mxu1 %vm338_vm1, %v6114_v12  ;;  %5029 = vmatprep.mubr.msk.f32.mxu0 %vm338_vm1, %v3124_v49 }
 0x116   : > { %4809 = vmatmul.mubr.msk.f32.gmra.mrb[16].mxu1 %vm338_vm1, %v6124_v35  ;;  %5030 = vmatmul.mubr.msk.f32.gmra.mrb[30].mxu0 %vm338_vm1, %v3125_v40  ;;  %v1939_v35 = vld [vmem:[#allocation2 + $0xd9] sm:$0xff] }
 0x117   : > { %4811 = vmatprep.mubr.msk.f32.mxu1 %vm338_vm1, %v6126_v38  ;;  %5034 = vmatprep.mubr.msk.f32.mxu0 %vm338_vm1, %v5864_v42  ;;  %v1941_v38 = vld [vmem:[#allocation2 + $0xf1] sm:$0xff] }
 0x118   : > { %v6698_v42 = vld [vmem:[#allocation35_spill] sm:$0xff] }
 0x11a   : > { %4812 = vmatmul.mubr.msk.f32.gmra.mrb[18].mxu1 %vm338_vm1, %v6141_v36  ;;  %5035 = vmatmul.mubr.msk.f32.vlgmr.msra.gmra.mrb[0].mxu0 %vm338_vm1, %v5881_v45  ;;  %v1940_v36 = vld [vmem:[#allocation2 + $0xe1] sm:$0xff] }
 0x11b   : > { %4814 = vmatprep.mubr.msk.f32.mxu1 %vm338_vm1, %v6145_v17  ;;  %5037 = vmatprep.mubr.msk.f32.mxu0 %vm338_vm1, %v5887_v47  ;;  %v3514_v45 = vld [vmem:[#allocation2 + $0x19a] sm:$0xff] }
 0x11c   : > { %v6699_v47 = vld [vmem:[#allocation36_spill] sm:$0xff] }
 0x11e   : > { %4815 = vmatmul.mubr.msk.f32.gmra.mrb[20].mxu1 %vm338_vm1, %v6157_v43  ;;  %5038 = vmatmul.mubr.msk.f32.gmra.mrb[2].mxu0 %vm338_vm1, %v5901_v48 }
 0x11f   : > { %4817 = vmatprep.mubr.msk.f32.mxu1 %vm338_vm1, %v6159_v20  ;;  %5040 = vmatprep.mubr.msk.f32.mxu0 %vm338_vm1, %v5905_v50 }
 0x122   : > { %4818 = vmatmul.mubr.msk.f32.gmra.mrb[22].mxu1 %vm338_vm1, %v6169_v5  ;;  %5041 = vmatmul.mubr.msk.f32.gmra.mrb[4].mxu0 %vm338_vm1, %v5917_v52 }
 0x123   : > { %4820 = vmatprep.mubr.msk.f32.mxu1 %vm338_vm1, %v6171_v10  ;;  %5043 = vmatprep.mubr.msk.f32.mxu0 %vm338_vm1, %v5921_v54 }
 0x126   : > { %4821 = vmatmul.mubr.msk.f32.gmra.mrb[24].mxu1 %vm338_vm1, %v6181_v28  ;;  %5044 = vmatmul.mubr.msk.f32.gmra.mrb[6].mxu0 %vm338_vm1, %v5933_v56 }
 0x127   : > { %4823 = vmatprep.mubr.msk.f32.mxu1 %vm338_vm1, %v6183_v26  ;;  %5046 = vmatprep.mubr.msk.f32.mxu0 %vm338_vm1, %v5937_v58 }
 0x12a   : > { %4824 = vmatmul.mubr.msk.f32.gmra.mrb[26].mxu1 %vm338_vm1, %v6193_v62  ;;  %5047 = vmatmul.mubr.msk.f32.gmra.mrb[8].mxu0 %vm338_vm1, %v5949_v60 }
 0x12b   : > { %4826 = vmatprep.mubr.msk.f32.mxu1 %vm338_vm1, %v6195_v9  ;;  %5049 = vmatprep.mubr.msk.f32.mxu0 %vm338_vm1, %v5953_v63 }
 0x12e   : > { %4827 = vmatmul.mubr.msk.f32.gmra.mrb[28].mxu1 %vm338_vm1, %v6205_v53  ;;  %5050 = vmatmul.mubr.msk.f32.gmra.mrb[10].mxu0 %vm338_vm1, %v5965_v1 }
 0x12f   : > { %4829 = vmatprep.mubr.msk.f32.mxu1 %vm338_vm1, %v6265_v37  ;;  %5052 = vmatprep.mubr.msk.f32.mxu0 %vm338_vm1, %v5967_v8 }
 0x132   : > { %4830 = vmatmul.mubr.msk.f32.gmra.mrb[30].mxu1 %vm338_vm1, %v6275_v39  ;;  %5053 = vmatmul.mubr.msk.f32.gmra.mrb[12].mxu0 %vm338_vm1, %v5976_v11 }
 0x133   : > { %4858 = vmatprep.mubr.msk.f32.mxu1 %vm338_vm1, %v1939_v35  ;;  %5055 = vmatprep.mubr.msk.f32.mxu0 %vm338_vm1, %v5980_v13 }
 0x136   : > { %4859 = vmatmul.mubr.msk.f32.vlgmr.msra.gmra.mrb[16].mxu1 %vm338_vm1, %v1940_v36  ;;  %5056 = vmatmul.mubr.msk.f32.gmra.mrb[14].mxu0 %vm338_vm1, %v5996_v16 }
 0x137   : > { %4861 = vmatprep.mubr.msk.f32.mxu1 %vm338_vm1, %v1941_v38  ;;  %5058 = vmatprep.mubr.msk.f32.mxu0 %vm338_vm1, %v6002_v18 }
 0x13a   : > { %4862 = vmatmul.mubr.msk.f32.gmra.mrb[18].mxu1 %vm338_vm1, %v1942_v41  ;;  %5059 = vmatmul.mubr.msk.f32.gmra.mrb[16].mxu0 %vm338_vm1, %v6016_v19 }
 0x13b   : > { %4864 = vmatprep.mubr.msk.f32.mxu1 %vm338_vm1, %v6680_v33  ;;  %5061 = vmatprep.mubr.msk.f32.mxu0 %vm338_vm1, %v6020_v22 }
 0x13e   : > { %4865 = vmatmul.mubr.msk.f32.gmra.mrb[20].mxu1 %vm338_vm1, %v6682_v44  ;;  %5062 = vmatmul.mubr.msk.f32.gmra.mrb[18].mxu0 %vm338_vm1, %v6032_v25 }
 0x13f   : > { %4867 = vmatprep.mubr.msk.f32.mxu1 %vm338_vm1, %v6684_v2  ;;  %5064 = vmatprep.mubr.msk.f32.mxu0 %vm338_vm1, %v6036_v27 }
 0x142   : > { %4868 = vmatmul.mubr.msk.f32.gmra.mrb[22].mxu1 %vm338_vm1, %v6686_v57  ;;  %5065 = vmatmul.mubr.msk.f32.gmra.mrb[20].mxu0 %vm338_vm1, %v6048_v3 }
 0x143   : > { %4870 = vmatprep.mubr.msk.f32.mxu1 %vm338_vm1, %v6688_v46  ;;  %5067 = vmatprep.mubr.msk.f32.mxu0 %vm338_vm1, %v6052_v0 }
 0x146   : > { %4871 = vmatmul.mubr.msk.f32.gmra.mrb[24].mxu1 %vm338_vm1, %v6690_v7  ;;  %5068 = vmatmul.mubr.msk.f32.gmra.mrb[22].mxu0 %vm338_vm1, %v6064_v59 }
 0x147   : > { %4873 = vmatprep.mubr.msk.f32.mxu1 %vm338_vm1, %v6692_v23  ;;  %5070 = vmatprep.mubr.msk.f32.mxu0 %vm338_vm1, %v6068_v55 }
 0x14a   : > { %4874 = vmatmul.mubr.msk.f32.gmra.mrb[26].mxu1 %vm338_vm1, %v6694_v6  ;;  %5071 = vmatmul.mubr.msk.f32.gmra.mrb[24].mxu0 %vm338_vm1, %v6080_v51 }
 0x14b   : > { %4876 = vmatprep.mubr.msk.f32.mxu1 %vm338_vm1, %v6695_v31  ;;  %5073 = vmatprep.mubr.msk.f32.mxu0 %vm338_vm1, %v6084_v30  ;;  %v3515_v30 = vld [vmem:[#allocation2 + $0x1a2] sm:$0xff] }
 0x14e   : > { %4877 = vmatmul.mubr.msk.f32.gmra.mrb[28].mxu1 %vm338_vm1, %v6697_v14  ;;  %5074 = vmatmul.mubr.msk.f32.gmra.mrb[26].mxu0 %vm338_vm1, %v6669_v24 }
 0x14f   : > { %4879 = vmatprep.mubr.msk.f32.mxu1 %vm338_vm1, %v6399_v32  ;;  %5076 = vmatprep.mubr.msk.f32.mxu0 %vm338_vm1, %v6698_v42 }
 0x152   : > { %4880 = vmatmul.mubr.msk.f32.gmra.mrb[30].mxu1 %vm338_vm1, %v6409_v4  ;;  %5077 = vmatmul.mubr.msk.f32.gmra.mrb[28].mxu0 %vm338_vm1, %v6699_v47 }
 0x153   : > { %5079 = vmatprep.mubr.msk.f32.mxu0 %vm338_vm1, %v3514_v45 }
 0x156   : > { %5080 = vmatmul.mubr.msk.f32.gmra.mrb[30].mxu0 %vm338_vm1, %v3515_v30 }
 0x1c9   : > { %v4786_v48 = vpop.f32.mrb[0].mxu1 }
 0x1ca   : > { %v1732_v50 = vpop.f32.mrb[1].mxu1 }
 0x1cd   : > { %v4789_v51 = vpop.f32.mrb[2].mxu1 }
 0x1ce   : > { %v1742_v52 = vpop.f32.mrb[3].mxu1 }
 0x1d1   : > { %v4792_v53 = vpop.f32.mrb[4].mxu1 }
 0x1d2   : > { %v1752_v54 = vpop.f32.mrb[5].mxu1 }
 0x1d5   : > { %v4795_v55 = vpop.f32.mrb[6].mxu1 }
 0x1d6   : > { %v1762_v56 = vpop.f32.mrb[7].mxu1 }
 0x1d9   : > { %v4798_v58 = vpop.f32.mrb[8].mxu1 }
 0x1da   : > { %v1772_v59 = vpop.f32.mrb[9].mxu1 }
 0x1dd   : > { %v4801_v60 = vpop.f32.mrb[10].mxu1 }
 0x1de   : > { %v1782_v62 = vpop.f32.mrb[11].mxu1 }
 0x1e1   : > { %v4804_v63 = vpop.f32.mrb[12].mxu1 }
 0x1e2   : > { %v1792_v0 = vpop.f32.mrb[13].mxu1 }
 0x1e5   : > { %v4807_v1 = vpop.f32.mrb[14].mxu1 }
 0x1e6   : > { %v1802_v8 = vpop.f32.mrb[15].mxu1 }
 0x1ed   : > { %v5036_v11 = vpop.f32.mrb[0].mxu0 }
 0x1ee   : > { %v5084_v12 = vadd.f32 %v5036_v11, %v4786_v48  ;;  %v3683_v13 = vpop.f32.mrb[1].mxu0 }
 0x1ef   : > { %v5085_v15 = vadd.f32 %v3683_v13, %v1732_v50 }
 0x1f1   : > { %v5039_v16 = vpop.f32.mrb[2].mxu0  ;;  %3874 = vxpose.xlu0.b32.start [1/16] (narrow) %v5085_v15, 8 }
 0x1f2   : > { %v5086_v17 = vadd.f32 %v5039_v16, %v4789_v51  ;;  %v3693_v18 = vpop.f32.mrb[3].mxu0 }
 0x1f3   : > { %v5087_v10 = vadd.f32 %v3693_v18, %v1742_v52 }
 0x1f5   : > { %v5042_v19 = vpop.f32.mrb[4].mxu0  ;;  %3875 = vxpose.xlu0.b32.cont [2/16] (narrow) %v5084_v12, 8 }
 0x1f6   : > { %v5088_v20 = vadd.f32 %v5042_v19, %v4792_v53  ;;  %v3703_v22 = vpop.f32.mrb[5].mxu0 }
 0x1f7   : > { %v5089_v5 = vadd.f32 %v3703_v22, %v1752_v54 }
 0x1f9   : > { %v5045_v25 = vpop.f32.mrb[6].mxu0  ;;  %3876 = vxpose.xlu0.b32.cont [3/16] (narrow) %v5087_v10, 8 }
 0x1fa   : > { %v5090_v26 = vadd.f32 %v5045_v25, %v4795_v55  ;;  %v3713_v27 = vpop.f32.mrb[7].mxu0 }
 0x1fb   : > { %v5091_v28 = vadd.f32 %v3713_v27, %v1762_v56 }
 0x1fd   : > { %v5048_v3 = vpop.f32.mrb[8].mxu0  ;;  %3877 = vxpose.xlu0.b32.cont [4/16] (narrow) %v5086_v17, 8 }
 0x1fe   : > { %v5092_v9 = vadd.f32 %v5048_v3, %v4798_v58  ;;  %v3723_v43 = vpop.f32.mrb[9].mxu0 }
 0x1ff   : > { %v5093_v37 = vadd.f32 %v3723_v43, %v1772_v59 }
 0x201   : > { %v5051_v39 = vpop.f32.mrb[10].mxu0  ;;  %3878 = vxpose.xlu0.b32.cont [5/16] (narrow) %v5089_v5, 8 }
 0x202   : > { %v5094_v24 = vadd.f32 %v5051_v39, %v4801_v60  ;;  %v3733_v33 = vpop.f32.mrb[11].mxu0 }
 0x203   : > { %v5095_v44 = vadd.f32 %v3733_v33, %v1782_v62 }
 0x205   : > { %v5054_v2 = vpop.f32.mrb[12].mxu0  ;;  %3879 = vxpose.xlu0.b32.cont [6/16] (narrow) %v5088_v20, 8 }
 0x206   : > { %v5096_v57 = vadd.f32 %v5054_v2, %v4804_v63  ;;  %v3743_v46 = vpop.f32.mrb[13].mxu0 }
 0x207   : > { %v5097_v61 = vadd.f32 %v3743_v46, %v1792_v0 }
 0x209   : > { %v5057_v7 = vpop.f32.mrb[14].mxu0  ;;  %3880 = vxpose.xlu0.b32.cont [7/16] (narrow) %v5091_v28, 8  ;;  %v4860_v21 = vpop.f32.mrb[16].mxu1 }
 0x20a   : > { %v6539_v23 = vadd.f32 %v5057_v7, %v4807_v1  ;;  %v2202_v29 = vpop.f32.mrb[17].mxu1  ;;  %v3753_v6 = vpop.f32.mrb[15].mxu0 }
 0x20b   : > { %v5099_v31 = vadd.f32 %v3753_v6, %v1802_v8 }
 0x20d   : > { %v5060_v32 = vpop.f32.mrb[16].mxu0  ;;  %3881 = vxpose.xlu0.b32.cont [8/16] (narrow) %v5090_v26, 8  ;;  %v4863_v34 = vpop.f32.mrb[18].mxu1 }
 0x20e   : > { %v5100_v14 = vadd.f32 %v5060_v32, %v4860_v21  ;;  %v2212_v4 = vpop.f32.mrb[19].mxu1  ;;  %v3763_v49 = vpop.f32.mrb[17].mxu0 }
 0x20f   : > { %v5101_v40 = vadd.f32 %v3763_v49, %v2202_v29 }
 0x211   : > { %v5063_v35 = vpop.f32.mrb[18].mxu0  ;;  %3882 = vxpose.xlu0.b32.cont [9/16] (narrow) %v5093_v37, 8  ;;  %3906 = vxpose.xlu1.b32.start [1/16] (narrow) %v5101_v40, 8  ;;  %v4866_v36 = vpop.f32.mrb[20].mxu1 }
 0x212   : > { %v5102_v38 = vadd.f32 %v5063_v35, %v4863_v34  ;;  %v2222_v41 = vpop.f32.mrb[21].mxu1  ;;  %v3773_v42 = vpop.f32.mrb[19].mxu0 }
 0x213   : > { %v5103_v45 = vadd.f32 %v3773_v42, %v2212_v4 }
 0x215   : > { %v5066_v47 = vpop.f32.mrb[20].mxu0  ;;  %3883 = vxpose.xlu0.b32.cont [10/16] (narrow) %v5092_v9, 8  ;;  %3907 = vxpose.xlu1.b32.cont [2/16] (narrow) %v5100_v14, 8  ;;  %v4869_v30 = vpop.f32.mrb[22].mxu1 }
 0x216   : > { %v5104_v48 = vadd.f32 %v5066_v47, %v4866_v36  ;;  %v2232_v50 = vpop.f32.mrb[23].mxu1  ;;  %v3783_v51 = vpop.f32.mrb[21].mxu0 }
 0x217   : > { %v5105_v52 = vadd.f32 %v3783_v51, %v2222_v41 }
 0x219   : > { %v5069_v53 = vpop.f32.mrb[22].mxu0  ;;  %3884 = vxpose.xlu0.b32.cont [11/16] (narrow) %v5095_v44, 8  ;;  %3908 = vxpose.xlu1.b32.cont [3/16] (narrow) %v5103_v45, 8  ;;  %v4872_v54 = vpop.f32.mrb[24].mxu1 }
 0x21a   : > { %v5106_v55 = vadd.f32 %v5069_v53, %v4869_v30  ;;  %v2242_v56 = vpop.f32.mrb[25].mxu1  ;;  %v3793_v58 = vpop.f32.mrb[23].mxu0 }
 0x21b   : > { %v5107_v59 = vadd.f32 %v3793_v58, %v2232_v50 }
 0x21d   : > { %v5072_v60 = vpop.f32.mrb[24].mxu0  ;;  %3885 = vxpose.xlu0.b32.cont [12/16] (narrow) %v5094_v24, 8  ;;  %3909 = vxpose.xlu1.b32.cont [4/16] (narrow) %v5102_v38, 8  ;;  %v4875_v62 = vpop.f32.mrb[26].mxu1 }
 0x21e   : > { %v5108_v63 = vadd.f32 %v5072_v60, %v4872_v54  ;;  %v2252_v0 = vpop.f32.mrb[27].mxu1  ;;  %v3803_v1 = vpop.f32.mrb[25].mxu0 }
 0x21f   : > { %v5109_v8 = vadd.f32 %v3803_v1, %v2242_v56 }
 0x221   : > { %v5075_v11 = vpop.f32.mrb[26].mxu0  ;;  %3886 = vxpose.xlu0.b32.cont [13/16] (narrow) %v5097_v61, 8  ;;  %3910 = vxpose.xlu1.b32.cont [5/16] (narrow) %v5105_v52, 8  ;;  %v4878_v12 = vpop.f32.mrb[28].mxu1 }
 0x222   : > { %v5110_v13 = vadd.f32 %v5075_v11, %v4875_v62  ;;  %v2262_v15 = vpop.f32.mrb[29].mxu1  ;;  %v3813_v16 = vpop.f32.mrb[27].mxu0 }
 0x223   : > { %v5111_v17 = vadd.f32 %v3813_v16, %v2252_v0 }
 0x225   : > { %v5078_v18 = vpop.f32.mrb[28].mxu0  ;;  %3887 = vxpose.xlu0.b32.cont [14/16] (narrow) %v5096_v57, 8  ;;  %3911 = vxpose.xlu1.b32.cont [6/16] (narrow) %v5104_v48, 8  ;;  %v4881_v10 = vpop.f32.mrb[30].mxu1 }
 0x226   : > { %v5112_v19 = vadd.f32 %v5078_v18, %v4878_v12  ;;  %v2272_v20 = vpop.f32.mrb[31].mxu1  ;;  %v3823_v22 = vpop.f32.mrb[29].mxu0 }
 0x227   : > { %v5113_v5 = vadd.f32 %v3823_v22, %v2262_v15 }
 0x229   : > { %v5081_v25 = vpop.f32.mrb[30].mxu0  ;;  %3888 = vxpose.xlu0.b32.cont [15/16] (narrow) %v5099_v31, 8  ;;  %3912 = vxpose.xlu1.b32.cont [7/16] (narrow) %v5107_v59, 8 }
 0x22a   : > { %v5114_v26 = vadd.f32 %v5081_v25, %v4881_v10  ;;  %v3833_v27 = vpop.f32.mrb[31].mxu0 }
 0x22b   : > { %v5115_v28 = vadd.f32 %v3833_v27, %v2272_v20 }
 0x22d   : > { %3889 = vxpose.xlu0.b32.end [16/16] (narrow) %v6539_v23, 8  ;;  %3913 = vxpose.xlu1.b32.cont [8/16] (narrow) %v5106_v55, 8 }
 0x231   : > { %3914 = vxpose.xlu1.b32.cont [9/16] (narrow) %v5109_v8, 8 }
 0x235   : > { %3915 = vxpose.xlu1.b32.cont [10/16] (narrow) %v5108_v63, 8 }
 0x239   : > { %3916 = vxpose.xlu1.b32.cont [11/16] (narrow) %v5111_v17, 8 }
 0x23d   : > { %3917 = vxpose.xlu1.b32.cont [12/16] (narrow) %v5110_v13, 8 }
 0x241   : > { %3918 = vxpose.xlu1.b32.cont [13/16] (narrow) %v5113_v5, 8 }
 0x245   : > { %3919 = vxpose.xlu1.b32.cont [14/16] (narrow) %v5112_v19, 8 }
 0x249   : > { %3920 = vxpose.xlu1.b32.cont [15/16] (narrow) %v5115_v28, 8 }
 0x24d   : > { %3921 = vxpose.xlu1.b32.end [16/16] (narrow) %v5114_v26, 8 }
 0x271   : > { %v3890_v3 = vpop.trf.xlu0 }
 0x272   : > { %3938 = vst [vmem:[%s190_s13] sm:$0xff] %v3890_v3 }
 0x291   : > { %v3922_v9 = vpop.trf.xlu1 }
 0x292   : > { %3939 = vst [vmem:[%s190_s13 + $0x8] sm:$0xff] %v3922_v9 }
 0x293   : > { %5393 = shalt.err (!%p5390_p3)
}
 0x294   : > { %s5394_s6 = scalar_lea.hbm %s6549_s27, 256  ;;  %s5398_s9 = scalar_lea.hbm %s6593_s4, 512 }
 0x295   : > { %p5395_p4 = scmp.ne.s32.totalorder %s6549_s27, %s5394_s6  ;;  %p5399_p9 = scmp.lt.u32.totalorder %s6549_s27, %s6593_s4 }
 0x296   : > { %p5400_p10 = scmp.lt.u32.totalorder %s5398_s9, %s5394_s6  ;;  %p5402_p12 = scmp.lt.u32.totalorder %s5394_s6, %s6549_s27 }
 0x297   : > { %p5396_p7 = pnand %p5395_p4, %p5509_p5 }
 0x298   : > { %p5401_p11 = por %p5400_p10, %p5399_p9 }
 0x299   : > { %p5397_p8 = pneg %p5396_p7 }
 0x29a   : > { %p5403_p13 = por %p5402_p12, %p5401_p11 }
 0x29c   : > { %p5404_p0 = pnand %p5403_p13, %p5397_p8 }
 0x29e   : > { %5407 = shalt.err (!%p5404_p0)
}
 0x29f   : > { %5340 = dma.vmem_to_hbm [thread:$0]  (%p5509_p5), %s6544_s14, 256, %s6549_s27, %s3941_s28  }
 0x2a0 PF: > { %p5346_p1 = scmp.ge.s32.totalorder %s5442_s18, 2  ;;  %s3967_s12 = sand.u32 1, %s5430_s15  }
 0x2a1   : > { %s3968_s13 = scalar_lea.sflag [#allocation4], %s3967_s12 }
 0x2a2   : > { %p5343_p2 = pnand %p5346_p1, %p5513_p6 }
 0x2a4   : > { %5425 = dma.done.wait (!%p5343_p2), %s3968_s13, 256  }
 0x2a5   : > { %5427 = vsyncadd (!%p5343_p2), %s3968_s13, 4294967040  ;;  %p14_p3 = scmp.ge.s32.totalorder %s5496_s21, 4   ;;  %s6700_s15 = smov %s5434_s16 }
 0x2a6   : > { %s6701_s16 = smov %s5438_s17  ;;  %s6702_s17 = smov %s5507_s24 }
 0x2a7   : > { %s6703_s18 = smov %s5496_s21  ;;  %16 = sbr.rel (!%p14_p3) target bundleno = 3 (0x3), region = 81 }
 0x2ae   :  { %3973 = vsyncpa [#allocation4], 1 }
 0x2af   :  { %3975 = vsyncpa [#allocation4 + $0x1], 1 }

</bundles_post_ra>
